<compile_context>
chip_gen: v6e
topology: v6e:2x2x1
jax: 0.10.0
libtpu: 0.0.40
codegen_flags: <defaults>
</compile_context>

<pallas_src>
import jax
import jax.numpy as jnp
from jax.experimental import pallas as pl
from jax.experimental.pallas import tpu as pltpu

C = 128      # stand-in for 1024 channels
NG = 32      # GroupNorm groups (same as the module)
KHW = 9      # 3x3 spatial kernel, im2col'd
EPS = 1e-5   # PyTorch GroupNorm default eps

MAT_KEYS = ("wc", "w1a", "w1b", "w2", "w3a", "w3b")   # bf16 in the kernel


def _make_kernel(bb, t, c, ng):
    """Kernel for one (batch-block, k-tile) grid step: bb samples x t time steps."""
    rows = bb * t
    inv_cnt = 1.0 / float(t * (c // ng))

    def kernel(xp_ref, att_ref, wc_ref, vecs_ref, g_ref, gt_ref,
               w1a_ref, w1b_ref, w2_ref, w3a_ref, w3b_ref,
               out1_ref, out2_ref, acc_ref):
        k = pl.program_id(1)

        @pl.when(k == 0)
        def _():
            acc_ref[...] = jnp.zeros_like(acc_ref)

        # Conv3d(k=[1,3,3], valid, H=W=3) as a K-tiled (rows, tk)@(tk, c) bf16 matmul, f32 acc.
        acc_ref[...] += jnp.dot(xp_ref[...], wc_ref[...],
                                preferred_element_type=jnp.float32)

        @pl.when(k == pl.num_programs(1) - 1)
        def _():
            vecs = vecs_ref[...]                      # (8, c) f32 packed bias/affine rows
            bc, gamma, beta = vecs[0:1], vecs[1:2], vecs[2:3]
            b1, b2, b3a, b3b = vecs[3:4], vecs[4:5], vecs[5:6], vecs[6:7]

            y = acc_ref[...] + bc                     # (rows, c) conv output, f32
            y3 = y.reshape(bb, t, c)

            # GroupNorm(ng, c): per-sample, two-pass (centered) stats in f32.
            s1 = jnp.sum(y3, axis=1)                                          # (bb, c)
            mean_g = jnp.dot(s1, g_ref[...],
                             preferred_element_type=jnp.float32) * inv_cnt    # (bb, ng)
            mean_c = jnp.dot(mean_g, gt_ref[...],
                             preferred_element_type=jnp.float32)              # (bb, c)
            d = y3 - mean_c[:, None, :]
            s2 = jnp.sum(d * d, axis=1)                                       # (bb, c)
            var_g = jnp.dot(s2, g_ref[...],
                            preferred_element_type=jnp.float32) * inv_cnt     # (bb, ng)
            inv_g = jax.lax.rsqrt(var_g + EPS)
            inv_c = jnp.dot(inv_g, gt_ref[...],
                            preferred_element_type=jnp.float32)               # (bb, c)
            scale_c = inv_c * gamma                   # GN affine folded into the norm
            yn = (d * scale_c[:, None, :]).reshape(rows, c) + beta
            yn = jnp.maximum(yn, 0.0)                 # ReLU (f32)

            # MLP: cat([conv, att]) @ fc1 computed as two half matmuls (no (rows, 2C)
            # concat); fc3 split into two (c, c) matmuls written straight to the outputs.
            yb = yn.astype(jnp.bfloat16)
            h = (jnp.dot(yb, w1a_ref[...], preferred_element_type=jnp.float32)
                 + jnp.dot(att_ref[...], w1b_ref[...], preferred_element_type=jnp.float32)
                 + b1)
            h = jnp.maximum(h, 0.0).astype(jnp.bfloat16)                      # fc1 + ReLU
            h = jnp.dot(h, w2_ref[...], preferred_element_type=jnp.float32) + b2
            h = jnp.maximum(h, 0.0).astype(jnp.bfloat16)                      # fc2 + ReLU
            out1_ref[...] = (jnp.dot(h, w3a_ref[...], preferred_element_type=jnp.float32)
                             + b3a).astype(out1_ref.dtype)
            out2_ref[...] = (jnp.dot(h, w3b_ref[...], preferred_element_type=jnp.float32)
                             + b3b).astype(out2_ref.dtype)

    return kernel


def _pick_bb(n, t, rows_target):
    """Samples per grid step: prefer MXU-aligned (128/16) M blocks and an even >=2 grid."""
    cands = [b for b in range(1, n + 1)
             if n % b == 0 and ((b * t) % 8 == 0 or b == n)]
    small = [b for b in cands if b * t <= max(rows_target, t)]
    pool = small if small else [n]

    def score(b):
        rows = b * t
        align = 2 if rows % 128 == 0 else (1 if rows % 16 == 0 else 0)
        two_cores = 1 if (n // b) >= 2 and (n // b) % 2 == 0 else 0
        return (align, two_cores, b)

    return max(pool, key=score)


def _pick_k_tiles(k_full, c):
    """Number of conv-reduction tiles so the bf16 wc chunk stays ~<= 5 MiB (v7x VMEM)."""
    if k_full * c * 2 <= (6 << 20):
        return 1, k_full
    for kt in (2, 3, 4, 6, 8, 9, 12, 18):
        if k_full % kt:
            continue
        tk = k_full // kt
        if tk % 128 == 0 and tk * c * 2 <= (5 << 20):
            return kt, tk
    return 1, k_full   # TODO(synk): no lane-aligned split found; keep the weight resident


def _vmem_limit_bytes():
    try:
        cap = int(pltpu.get_tpu_info().vmem_capacity_bytes)
    except Exception:
        cap = 64 * 1024 * 1024
    return max(32 * 1024 * 1024, min((cap * 3) // 4, 100 * 1024 * 1024))


def init_params(key):
    ks = jax.random.split(key, 13)
    s = 0.1
    gmat = (jnp.arange(C)[:, None] // (C // NG)
            == jnp.arange(NG)[None, :]).astype(jnp.float32)                   # (C, NG) one-hot
    return dict(
        wc=jax.random.normal(ks[0], (C * KHW, C), jnp.float32) * s,           # conv weight (im2col'd)
        bc=jax.random.normal(ks[1], (1, C), jnp.float32) * s,
        gamma=1.0 + jax.random.normal(ks[2], (1, C), jnp.float32) * s,
        beta=jax.random.normal(ks[3], (1, C), jnp.float32) * s,
        w1a=jax.random.normal(ks[4], (C, C), jnp.float32) * s,                # fc1 half acting on conv out
        w1b=jax.random.normal(ks[5], (C, C), jnp.float32) * s,                # fc1 half acting on att
        b1=jax.random.normal(ks[6], (1, C), jnp.float32) * s,
        w2=jax.random.normal(ks[7], (C, C), jnp.float32) * s,
        b2=jax.random.normal(ks[8], (1, C), jnp.float32) * s,
        w3a=jax.random.normal(ks[9], (C, C), jnp.float32) * s,                # fc3 -> first output half
        w3b=jax.random.normal(ks[10], (C, C), jnp.float32) * s,               # fc3 -> second output half
        b3a=jax.random.normal(ks[11], (1, C), jnp.float32) * s,
        b3b=jax.random.normal(ks[12], (1, C), jnp.float32) * s,
        gmat=gmat, gmatT=gmat.T,
    )


def cencoder_forward(x, att, p, rows_target=512):
    N, Cc, T, H, W = x.shape
    assert Cc == C and H == 3 and W == 3
    k_full = C * KHW

    # Glue: cast to bf16 FIRST (halves the HBM traffic of the transpose), then im2col
    # the [1,3,3] valid conv and fold (N, T) into one M axis.
    xp = jnp.transpose(x.astype(jnp.bfloat16), (0, 2, 1, 3, 4)).reshape(N * T, k_full)
    att_t = jnp.transpose(att.astype(jnp.bfloat16), (0, 2, 1)).reshape(N * T, C)

    # Pack the seven (1, C) bias/affine vectors into one (8, C) f32 tile.
    vecs = jnp.concatenate(
        [p["bc"], p["gamma"], p["beta"], p["b1"], p["b2"], p["b3a"], p["b3b"],
         jnp.zeros((1, C), jnp.float32)], axis=0).astype(jnp.float32)

    bb = _pick_bb(N, T, rows_target)
    rows = bb * T
    kt, tk = _pick_k_tiles(k_full, C)
    grid = (N // bb, kt)

    kernel = _make_kernel(bb, T, C, NG)

    def const2(shape):   # constant-index weight block: single-buffered (DMA'd once)
        return pl.BlockSpec(shape, lambda n, k: (0, 0), pipeline_mode=pl.Buffered(1))

    in_specs = [
        pl.BlockSpec((rows, tk), lambda n, k: (n, k)),      # xp (streams over K)
        pl.BlockSpec((rows, C), lambda n, k: (n, 0)),       # att (constant over K)
        pl.BlockSpec((tk, C), lambda n, k: (k, 0)),         # wc  (streams over K)
        const2((8, C)),                                      # packed bc/gamma/beta/b1/b2/b3a/b3b
        const2((C, NG)), const2((NG, C)),                    # gmat, gmatT
        const2((C, C)), const2((C, C)),                      # w1a, w1b
        const2((C, C)),                                      # w2
        const2((C, C)), const2((C, C)),                      # w3a, w3b
    ]
    out_specs = (pl.BlockSpec((rows, C), lambda n, k: (n, 0)),
                 pl.BlockSpec((rows, C), lambda n, k: (n, 0)))
    out_shape = (jax.ShapeDtypeStruct((N * T, C), jnp.float32),
                 jax.ShapeDtypeStruct((N * T, C), jnp.float32))

    fn = pl.pallas_call(
        kernel,
        grid=grid,
        in_specs=in_specs,
        out_specs=out_specs,
        out_shape=out_shape,
        scratch_shapes=[pltpu.VMEM((rows, C), jnp.float32)],     # conv accumulator
        compiler_params=pltpu.CompilerParams(
            dimension_semantics=("parallel", "arbitrary"),       # batch parallel, K reduction
            vmem_limit_bytes=_vmem_limit_bytes(),
        ),
    )
    o1, o2 = fn(xp, att_t, p["wc"], vecs, p["gmat"], p["gmatT"],
                p["w1a"], p["w1b"], p["w2"], p["w3a"], p["w3b"])
    return o1.reshape(N, T, C), o2.reshape(N, T, C)


def reference(x, att, p):
    """Pure-JAX f32 reference matching the PyTorch forward."""
    N, Cc, T, H, W = x.shape
    xp = jnp.transpose(x, (0, 2, 1, 3, 4)).reshape(N, T, C * KHW)
    y = xp @ p["wc"] + p["bc"]                                        # (N, T, C) conv out
    yg = jnp.transpose(y, (0, 2, 1)).reshape(N, NG, C // NG, T)
    mean = yg.mean(axis=(2, 3), keepdims=True)
    var = yg.var(axis=(2, 3), keepdims=True)
    yn = ((yg - mean) / jnp.sqrt(var + EPS)).reshape(N, C, T)
    yn = yn * p["gamma"][0][None, :, None] + p["beta"][0][None, :, None]
    yn = jnp.maximum(yn, 0.0)                                         # (N, C, T)
    yt = jnp.transpose(yn, (0, 2, 1))                                 # (N, T, C)
    at = jnp.transpose(att, (0, 2, 1))                                # (N, T, C)
    h = jnp.maximum(yt @ p["w1a"] + at @ p["w1b"] + p["b1"], 0.0)     # == cat + fc1 + ReLU
    h = jnp.maximum(h @ p["w2"] + p["b2"], 0.0)
    return h @ p["w3a"] + p["b3a"], h @ p["w3b"] + p["b3b"]           # == fc3 then split


if __name__ == "__main__":
    key = jax.random.PRNGKey(0)
    kx, ka, kp = jax.random.split(key, 3)
    N, T = 2, 8
    x = jax.random.normal(kx, (N, C, T, 3, 3), jnp.float32)   # (N, C, T, H=3, W=3)
    att = jax.random.normal(ka, (N, C, T), jnp.float32)       # (N, C, T)
    params = init_params(kp)

    # bf16 copies of the matmul weights for the kernel; stats/affine params stay f32.
    pk = {k: (v.astype(jnp.bfloat16) if k in MAT_KEYS else v) for k, v in params.items()}

    o1, o2 = cencoder_forward(x, att, pk)
    jax.block_until_ready((o1, o2))

    # Reference in f32 using the same bf16-rounded weights the kernel consumed.
    pr = {k: (v.astype(jnp.bfloat16).astype(jnp.float32) if k in MAT_KEYS else v)
          for k, v in params.items()}
    r1, r2 = reference(x, att, pr)

    assert o1.shape == (N, T, C) and o2.shape == (N, T, C)
    assert jnp.allclose(o1, r1, atol=5e-2, rtol=5e-2), float(jnp.max(jnp.abs(o1 - r1)))
    assert jnp.allclose(o2, r2, atol=5e-2, rtol=5e-2), float(jnp.max(jnp.abs(o2 - r2)))
    print("KERNEL_OK")
</pallas_src>

<mosaic_0001>
module attributes {stable_mosaic.version = 11 : i64} {
  func.func @kernel(%arg0: i32, %arg1: i32, %arg2: memref<16x1152xbf16, #tpu.memory_space<vmem>>, %arg3: memref<16x128xbf16, #tpu.memory_space<vmem>>, %arg4: memref<1152x128xbf16, #tpu.memory_space<vmem>>, %arg5: memref<8x128xf32, #tpu.memory_space<vmem>>, %arg6: memref<128x32xf32, #tpu.memory_space<vmem>>, %arg7: memref<32x128xf32, #tpu.memory_space<vmem>>, %arg8: memref<128x128xbf16, #tpu.memory_space<vmem>>, %arg9: memref<128x128xbf16, #tpu.memory_space<vmem>>, %arg10: memref<128x128xbf16, #tpu.memory_space<vmem>>, %arg11: memref<128x128xbf16, #tpu.memory_space<vmem>>, %arg12: memref<128x128xbf16, #tpu.memory_space<vmem>>, %arg13: memref<16x128xf32, #tpu.memory_space<vmem>>, %arg14: memref<16x128xf32, #tpu.memory_space<vmem>>, %arg15: memref<16x128xf32, #tpu.memory_space<vmem>>) attributes {dimension_semantics = [#tpu.dimension_semantics<parallel>, #tpu.dimension_semantics<arbitrary>], iteration_bounds = array<i64: 1, 1>, scalar_prefetch = 0 : i64, scratch_operands = 1 : i64, tpu.core_type = #tpu.core_type<tc>, window_params = [{transform_indices = @transform_0, window_bounds = array<i64: 16, 1152>}, {transform_indices = @transform_1, window_bounds = array<i64: 16, 128>}, {transform_indices = @transform_2, window_bounds = array<i64: 1152, 128>}, {pipeline_mode = #tpu.pipeline_mode<synchronous>, transform_indices = @transform_3, window_bounds = array<i64: 8, 128>}, {pipeline_mode = #tpu.pipeline_mode<synchronous>, transform_indices = @transform_4, window_bounds = array<i64: 128, 32>}, {pipeline_mode = #tpu.pipeline_mode<synchronous>, transform_indices = @transform_5, window_bounds = array<i64: 32, 128>}, {pipeline_mode = #tpu.pipeline_mode<synchronous>, transform_indices = @transform_6, window_bounds = array<i64: 128, 128>}, {pipeline_mode = #tpu.pipeline_mode<synchronous>, transform_indices = @transform_7, window_bounds = array<i64: 128, 128>}, {pipeline_mode = #tpu.pipeline_mode<synchronous>, transform_indices = @transform_8, window_bounds = array<i64: 128, 128>}, {pipeline_mode = #tpu.pipeline_mode<synchronous>, transform_indices = @transform_9, window_bounds = array<i64: 128, 128>}, {pipeline_mode = #tpu.pipeline_mode<synchronous>, transform_indices = @transform_10, window_bounds = array<i64: 128, 128>}, {transform_indices = @transform_11, window_bounds = array<i64: 16, 128>}, {transform_indices = @transform_12, window_bounds = array<i64: 16, 128>}]} {
    %c0_i32 = arith.constant 0 : i32
    %0 = arith.cmpi eq, %arg1, %c0_i32 : i32
    %1 = arith.extui %0 : i1 to i32
    %c0_i32_0 = arith.constant 0 : i32
    %2 = arith.cmpi ne, %1, %c0_i32_0 : i32
    scf.if %2 {
      %cst_10 = arith.constant 0.000000e+00 : f32
      %12 = vector.broadcast %cst_10 : f32 to vector<16x128xf32>
      %c0_11 = arith.constant 0 : index
      %c0_12 = arith.constant 0 : index
      %13 = vector.load %arg15[%c0_11, %c0_12] : memref<16x128xf32, #tpu.memory_space<vmem>>, vector<16x128xf32>
      tpu.vector_store %arg15[%c0_11, %c0_12], %12 {strides = array<i32>} : memref<16x128xf32, #tpu.memory_space<vmem>>, vector<16x128xf32>,
    } else {
    }
    %c0 = arith.constant 0 : index
    %c0_1 = arith.constant 0 : index
    %3 = vector.load %arg15[%c0, %c0_1] : memref<16x128xf32, #tpu.memory_space<vmem>>, vector<16x128xf32>
    %c0_2 = arith.constant 0 : index
    %c0_3 = arith.constant 0 : index
    %4 = vector.load %arg2[%c0_2, %c0_3] : memref<16x1152xbf16, #tpu.memory_space<vmem>>, vector<16x1152xbf16>
    %c0_4 = arith.constant 0 : index
    %c0_5 = arith.constant 0 : index
    %5 = vector.load %arg4[%c0_4, %c0_5] : memref<1152x128xbf16, #tpu.memory_space<vmem>>, vector<1152x128xbf16>
    %cst = arith.constant dense<0.000000e+00> : vector<16x128xf32>
    %6 = tpu.matmul %4, %5, %cst {dimension_numbers = #tpu.dot_dimension_numbers<[1], [0], [0], [1], [0, 0, 1, 1], [], []>} : vector<16x1152xbf16>, vector<1152x128xbf16>, vector<16x128xf32> -> vector<16x128xf32>
    %7 = arith.addf %3, %6 : vector<16x128xf32>
    %c0_6 = arith.constant 0 : index
    %c0_7 = arith.constant 0 : index
    %8 = vector.load %arg15[%c0_6, %c0_7] : memref<16x128xf32, #tpu.memory_space<vmem>>, vector<16x128xf32>
    tpu.vector_store %arg15[%c0_6, %c0_7], %7 {strides = array<i32>} : memref<16x128xf32, #tpu.memory_space<vmem>>, vector<16x128xf32>,
    %c0_i32_8 = arith.constant 0 : i32
    %9 = arith.cmpi eq, %arg1, %c0_i32_8 : i32
    %10 = arith.extui %9 : i1 to i32
    %c0_i32_9 = arith.constant 0 : i32
    %11 = arith.cmpi ne, %10, %c0_i32_9 : i32
    scf.if %11 {
      %c0_10 = arith.constant 0 : index
      %c0_11 = arith.constant 0 : index
      %12 = vector.load %arg5[%c0_10, %c0_11] : memref<8x128xf32, #tpu.memory_space<vmem>>, vector<8x128xf32>
      %13 = vector.extract_strided_slice %12 {offsets = [0, 0], sizes = [1, 128], strides = [1, 1]} : vector<8x128xf32> to vector<1x128xf32>
      %14 = vector.extract_strided_slice %12 {offsets = [1, 0], sizes = [1, 128], strides = [1, 1]} : vector<8x128xf32> to vector<1x128xf32>
      %15 = vector.extract_strided_slice %12 {offsets = [2, 0], sizes = [1, 128], strides = [1, 1]} : vector<8x128xf32> to vector<1x128xf32>
      %16 = vector.extract_strided_slice %12 {offsets = [3, 0], sizes = [1, 128], strides = [1, 1]} : vector<8x128xf32> to vector<1x128xf32>
      %17 = vector.extract_strided_slice %12 {offsets = [4, 0], sizes = [1, 128], strides = [1, 1]} : vector<8x128xf32> to vector<1x128xf32>
      %18 = vector.extract_strided_slice %12 {offsets = [5, 0], sizes = [1, 128], strides = [1, 1]} : vector<8x128xf32> to vector<1x128xf32>
      %19 = vector.extract_strided_slice %12 {offsets = [6, 0], sizes = [1, 128], strides = [1, 1]} : vector<8x128xf32> to vector<1x128xf32>
      %c0_12 = arith.constant 0 : index
      %c0_13 = arith.constant 0 : index
      %20 = vector.load %arg15[%c0_12, %c0_13] : memref<16x128xf32, #tpu.memory_space<vmem>>, vector<16x128xf32>
      %21 = vector.broadcast %13 : vector<1x128xf32> to vector<16x128xf32>
      %22 = arith.addf %20, %21 : vector<16x128xf32>
      %23 = vector.shape_cast %22 : vector<16x128xf32> to vector<2x8x128xf32>
      %cst_14 = arith.constant dense<0.000000e+00> : vector<2x128xf32>
      %24 = vector.multi_reduction <add>, %23, %cst_14 [1] : vector<2x8x128xf32> to vector<2x128xf32>
      %c0_15 = arith.constant 0 : index
      %c0_16 = arith.constant 0 : index
      %25 = vector.load %arg6[%c0_15, %c0_16] : memref<128x32xf32, #tpu.memory_space<vmem>>, vector<128x32xf32>
      %cst_17 = arith.constant dense<0.000000e+00> : vector<2x32xf32>
      %26 = tpu.matmul %24, %25, %cst_17 {dimension_numbers = #tpu.dot_dimension_numbers<[1], [0], [0], [1], [0, 0, 1, 1], [], []>} : vector<2x128xf32>, vector<128x32xf32>, vector<2x32xf32> -> vector<2x32xf32>
      %cst_18 = arith.constant 3.125000e-02 : f32
      %27 = vector.broadcast %cst_18 : f32 to vector<2x32xf32>
      %28 = arith.mulf %26, %27 : vector<2x32xf32>
      %c0_19 = arith.constant 0 : index
      %c0_20 = arith.constant 0 : index
      %29 = vector.load %arg7[%c0_19, %c0_20] : memref<32x128xf32, #tpu.memory_space<vmem>>, vector<32x128xf32>
      %cst_21 = arith.constant dense<0.000000e+00> : vector<2x128xf32>
      %30 = tpu.matmul %28, %29, %cst_21 {dimension_numbers = #tpu.dot_dimension_numbers<[1], [0], [0], [1], [0, 0, 1, 1], [], []>} : vector<2x32xf32>, vector<32x128xf32>, vector<2x128xf32> -> vector<2x128xf32>
      %31 = vector.shape_cast %30 : vector<2x128xf32> to vector<2x1x128xf32>
      %32 = vector.broadcast %31 : vector<2x1x128xf32> to vector<2x8x128xf32>
      %33 = arith.subf %23, %32 : vector<2x8x128xf32>
      %34 = arith.mulf %33, %33 : vector<2x8x128xf32>
      %cst_22 = arith.constant dense<0.000000e+00> : vector<2x128xf32>
      %35 = vector.multi_reduction <add>, %34, %cst_22 [1] : vector<2x8x128xf32> to vector<2x128xf32>
      %c0_23 = arith.constant 0 : index
      %c0_24 = arith.constant 0 : index
      %36 = vector.load %arg6[%c0_23, %c0_24] : memref<128x32xf32, #tpu.memory_space<vmem>>, vector<128x32xf32>
      %cst_25 = arith.constant dense<0.000000e+00> : vector<2x32xf32>
      %37 = tpu.matmul %35, %36, %cst_25 {dimension_numbers = #tpu.dot_dimension_numbers<[1], [0], [0], [1], [0, 0, 1, 1], [], []>} : vector<2x128xf32>, vector<128x32xf32>, vector<2x32xf32> -> vector<2x32xf32>
      %cst_26 = arith.constant 3.125000e-02 : f32
      %38 = vector.broadcast %cst_26 : f32 to vector<2x32xf32>
      %39 = arith.mulf %37, %38 : vector<2x32xf32>
      %cst_27 = arith.constant 9.99999974E-6 : f32
      %40 = vector.broadcast %cst_27 : f32 to vector<2x32xf32>
      %41 = arith.addf %39, %40 : vector<2x32xf32>
      %42 = math.rsqrt %41 : vector<2x32xf32>
      %c0_28 = arith.constant 0 : index
      %c0_29 = arith.constant 0 : index
      %43 = vector.load %arg7[%c0_28, %c0_29] : memref<32x128xf32, #tpu.memory_space<vmem>>, vector<32x128xf32>
      %cst_30 = arith.constant dense<0.000000e+00> : vector<2x128xf32>
      %44 = tpu.matmul %42, %43, %cst_30 {dimension_numbers = #tpu.dot_dimension_numbers<[1], [0], [0], [1], [0, 0, 1, 1], [], []>} : vector<2x32xf32>, vector<32x128xf32>, vector<2x128xf32> -> vector<2x128xf32>
      %45 = vector.broadcast %14 : vector<1x128xf32> to vector<2x128xf32>
      %46 = arith.mulf %44, %45 : vector<2x128xf32>
      %47 = vector.shape_cast %46 : vector<2x128xf32> to vector<2x1x128xf32>
      %48 = vector.broadcast %47 : vector<2x1x128xf32> to vector<2x8x128xf32>
      %49 = arith.mulf %33, %48 : vector<2x8x128xf32>
      %50 = vector.shape_cast %49 : vector<2x8x128xf32> to vector<16x128xf32>
      %51 = vector.broadcast %15 : vector<1x128xf32> to vector<16x128xf32>
      %52 = arith.addf %50, %51 : vector<16x128xf32>
      %cst_31 = arith.constant 0.000000e+00 : f32
      %53 = vector.broadcast %cst_31 : f32 to vector<16x128xf32>
      %54 = arith.maximumf %52, %53 : vector<16x128xf32>
      %55 = arith.truncf %54 : vector<16x128xf32> to vector<16x128xbf16>
      %c0_32 = arith.constant 0 : index
      %c0_33 = arith.constant 0 : index
      %56 = vector.load %arg8[%c0_32, %c0_33] : memref<128x128xbf16, #tpu.memory_space<vmem>>, vector<128x128xbf16>
      %cst_34 = arith.constant dense<0.000000e+00> : vector<16x128xf32>
      %57 = tpu.matmul %55, %56, %cst_34 {dimension_numbers = #tpu.dot_dimension_numbers<[1], [0], [0], [1], [0, 0, 1, 1], [], []>} : vector<16x128xbf16>, vector<128x128xbf16>, vector<16x128xf32> -> vector<16x128xf32>
      %c0_35 = arith.constant 0 : index
      %c0_36 = arith.constant 0 : index
      %58 = vector.load %arg3[%c0_35, %c0_36] : memref<16x128xbf16, #tpu.memory_space<vmem>>, vector<16x128xbf16>
      %c0_37 = arith.constant 0 : index
      %c0_38 = arith.constant 0 : index
      %59 = vector.load %arg9[%c0_37, %c0_38] : memref<128x128xbf16, #tpu.memory_space<vmem>>, vector<128x128xbf16>
      %cst_39 = arith.constant dense<0.000000e+00> : vector<16x128xf32>
      %60 = tpu.matmul %58, %59, %cst_39 {dimension_numbers = #tpu.dot_dimension_numbers<[1], [0], [0], [1], [0, 0, 1, 1], [], []>} : vector<16x128xbf16>, vector<128x128xbf16>, vector<16x128xf32> -> vector<16x128xf32>
      %61 = arith.addf %57, %60 : vector<16x128xf32>
      %62 = vector.broadcast %16 : vector<1x128xf32> to vector<16x128xf32>
      %63 = arith.addf %61, %62 : vector<16x128xf32>
      %cst_40 = arith.constant 0.000000e+00 : f32
      %64 = vector.broadcast %cst_40 : f32 to vector<16x128xf32>
      %65 = arith.maximumf %63, %64 : vector<16x128xf32>
      %66 = arith.truncf %65 : vector<16x128xf32> to vector<16x128xbf16>
      %c0_41 = arith.constant 0 : index
      %c0_42 = arith.constant 0 : index
      %67 = vector.load %arg10[%c0_41, %c0_42] : memref<128x128xbf16, #tpu.memory_space<vmem>>, vector<128x128xbf16>
      %cst_43 = arith.constant dense<0.000000e+00> : vector<16x128xf32>
      %68 = tpu.matmul %66, %67, %cst_43 {dimension_numbers = #tpu.dot_dimension_numbers<[1], [0], [0], [1], [0, 0, 1, 1], [], []>} : vector<16x128xbf16>, vector<128x128xbf16>, vector<16x128xf32> -> vector<16x128xf32>
      %69 = vector.broadcast %17 : vector<1x128xf32> to vector<16x128xf32>
      %70 = arith.addf %68, %69 : vector<16x128xf32>
      %cst_44 = arith.constant 0.000000e+00 : f32
      %71 = vector.broadcast %cst_44 : f32 to vector<16x128xf32>
      %72 = arith.maximumf %70, %71 : vector<16x128xf32>
      %73 = arith.truncf %72 : vector<16x128xf32> to vector<16x128xbf16>
      %c0_45 = arith.constant 0 : index
      %c0_46 = arith.constant 0 : index
      %74 = vector.load %arg11[%c0_45, %c0_46] : memref<128x128xbf16, #tpu.memory_space<vmem>>, vector<128x128xbf16>
      %cst_47 = arith.constant dense<0.000000e+00> : vector<16x128xf32>
      %75 = tpu.matmul %73, %74, %cst_47 {dimension_numbers = #tpu.dot_dimension_numbers<[1], [0], [0], [1], [0, 0, 1, 1], [], []>} : vector<16x128xbf16>, vector<128x128xbf16>, vector<16x128xf32> -> vector<16x128xf32>
      %76 = vector.broadcast %18 : vector<1x128xf32> to vector<16x128xf32>
      %77 = arith.addf %75, %76 : vector<16x128xf32>
      %c0_48 = arith.constant 0 : index
      %c0_49 = arith.constant 0 : index
      %78 = vector.load %arg13[%c0_48, %c0_49] : memref<16x128xf32, #tpu.memory_space<vmem>>, vector<16x128xf32>
      tpu.vector_store %arg13[%c0_48, %c0_49], %77 {strides = array<i32>} : memref<16x128xf32, #tpu.memory_space<vmem>>, vector<16x128xf32>,
      %c0_50 = arith.constant 0 : index
      %c0_51 = arith.constant 0 : index
      %79 = vector.load %arg12[%c0_50, %c0_51] : memref<128x128xbf16, #tpu.memory_space<vmem>>, vector<128x128xbf16>
      %cst_52 = arith.constant dense<0.000000e+00> : vector<16x128xf32>
      %80 = tpu.matmul %73, %79, %cst_52 {dimension_numbers = #tpu.dot_dimension_numbers<[1], [0], [0], [1], [0, 0, 1, 1], [], []>} : vector<16x128xbf16>, vector<128x128xbf16>, vector<16x128xf32> -> vector<16x128xf32>
      %81 = vector.broadcast %19 : vector<1x128xf32> to vector<16x128xf32>
      %82 = arith.addf %80, %81 : vector<16x128xf32>
      %c0_53 = arith.constant 0 : index
      %c0_54 = arith.constant 0 : index
      %83 = vector.load %arg14[%c0_53, %c0_54] : memref<16x128xf32, #tpu.memory_space<vmem>>, vector<16x128xf32>
      tpu.vector_store %arg14[%c0_53, %c0_54], %82 {strides = array<i32>} : memref<16x128xf32, #tpu.memory_space<vmem>>, vector<16x128xf32>,
    } else {
    }
    return
  }
  func.func @transform_0(%arg0: i32, %arg1: i32) -> (i32, i32) {
    %c0_i32 = arith.constant 0 : i32
    return %arg0, %arg1 : i32, i32
  }
  func.func @transform_1(%arg0: i32, %arg1: i32) -> (i32, i32) {
    %c0_i32 = arith.constant 0 : i32
    %c0_i32_0 = arith.constant 0 : i32
    return %arg0, %c0_i32 : i32, i32
  }
  func.func @transform_2(%arg0: i32, %arg1: i32) -> (i32, i32) {
    %c0_i32 = arith.constant 0 : i32
    %c0_i32_0 = arith.constant 0 : i32
    return %arg1, %c0_i32 : i32, i32
  }
  func.func @transform_3(%arg0: i32, %arg1: i32) -> (i32, i32) {
    %c0_i32 = arith.constant 0 : i32
    %c0_i32_0 = arith.constant 0 : i32
    %c0_i32_1 = arith.constant 0 : i32
    return %c0_i32, %c0_i32_0 : i32, i32
  }
  func.func @transform_4(%arg0: i32, %arg1: i32) -> (i32, i32) {
    %c0_i32 = arith.constant 0 : i32
    %c0_i32_0 = arith.constant 0 : i32
    %c0_i32_1 = arith.constant 0 : i32
    return %c0_i32, %c0_i32_0 : i32, i32
  }
  func.func @transform_5(%arg0: i32, %arg1: i32) -> (i32, i32) {
    %c0_i32 = arith.constant 0 : i32
    %c0_i32_0 = arith.constant 0 : i32
    %c0_i32_1 = arith.constant 0 : i32
    return %c0_i32, %c0_i32_0 : i32, i32
  }
  func.func @transform_6(%arg0: i32, %arg1: i32) -> (i32, i32) {
    %c0_i32 = arith.constant 0 : i32
    %c0_i32_0 = arith.constant 0 : i32
    %c0_i32_1 = arith.constant 0 : i32
    return %c0_i32, %c0_i32_0 : i32, i32
  }
  func.func @transform_7(%arg0: i32, %arg1: i32) -> (i32, i32) {
    %c0_i32 = arith.constant 0 : i32
    %c0_i32_0 = arith.constant 0 : i32
    %c0_i32_1 = arith.constant 0 : i32
    return %c0_i32, %c0_i32_0 : i32, i32
  }
  func.func @transform_8(%arg0: i32, %arg1: i32) -> (i32, i32) {
    %c0_i32 = arith.constant 0 : i32
    %c0_i32_0 = arith.constant 0 : i32
    %c0_i32_1 = arith.constant 0 : i32
    return %c0_i32, %c0_i32_0 : i32, i32
  }
  func.func @transform_9(%arg0: i32, %arg1: i32) -> (i32, i32) {
    %c0_i32 = arith.constant 0 : i32
    %c0_i32_0 = arith.constant 0 : i32
    %c0_i32_1 = arith.constant 0 : i32
    return %c0_i32, %c0_i32_0 : i32, i32
  }
  func.func @transform_10(%arg0: i32, %arg1: i32) -> (i32, i32) {
    %c0_i32 = arith.constant 0 : i32
    %c0_i32_0 = arith.constant 0 : i32
    %c0_i32_1 = arith.constant 0 : i32
    return %c0_i32, %c0_i32_0 : i32, i32
  }
  func.func @transform_11(%arg0: i32, %arg1: i32) -> (i32, i32) {
    %c0_i32 = arith.constant 0 : i32
    %c0_i32_0 = arith.constant 0 : i32
    return %arg0, %c0_i32 : i32, i32
  }
  func.func @transform_12(%arg0: i32, %arg1: i32) -> (i32, i32) {
    %c0_i32 = arith.constant 0 : i32
    %c0_i32_0 = arith.constant 0 : i32
    return %arg0, %c0_i32 : i32, i32
  }
}

</mosaic_0001>

<bundles_post_ra>
// kernel: tpu_custom_call.1
= control target key start
LH: loop header
LB: loop body
LE: loop exit
PB: predicated region body
PF: predicated region fallthrough
CT: control target
= control target key end

     0   :  { %18 = vsyncpa [#allocation4], 0  ;;  %s3357_s0 = inlined_call_operand.vmem [shape: bf16[16,1152], index: 0, kind: input, shape index: {}]   ;;  %s3358_s1 = inlined_call_operand.hbm [shape: bf16[16,128], index: 1, kind: input, shape index: {}]   ;;  %s3359_s2 = inlined_call_operand.hbm [shape: bf16[1152,128], index: 2, kind: input, shape index: {}]   ;;  %s3360_s3 = inlined_call_operand.hbm [shape: f32[8,128], index: 3, kind: input, shape index: {}]   ;;  %s3361_s4 = inlined_call_operand.vmem [shape: f32[128,32], index: 4, kind: input, shape index: {}]   ;;  %s3362_s5 = inlined_call_operand.vmem [shape: f32[32,128], index: 5, kind: input, shape index: {}]   ;;  %s3363_s6 = inlined_call_operand.vmem [shape: bf16[128,128], index: 6, kind: input, shape index: {}]   ;;  %s3364_s7 = inlined_call_operand.hbm [shape: bf16[128,128], index: 7, kind: input, shape index: {}]   ;;  %s3365_s8 = inlined_call_operand.hbm [shape: bf16[128,128], index: 8, kind: input, shape index: {}]   ;;  %s3366_s9 = inlined_call_operand.hbm [shape: bf16[128,128], index: 9, kind: input, shape index: {}]   ;;  %s3367_s10 = inlined_call_operand.hbm [shape: bf16[128,128], index: 10, kind: input, shape index: {}]   ;;  %s3368_s11 = inlined_call_operand.hbm [shape: f32[16,128], index: 11, kind: output, shape index: {0}]   ;;  %s3369_s12 = inlined_call_operand.hbm [shape: f32[16,128], index: 12, kind: output, shape index: {1}]  }
   0x1   :  { %19 = vsyncpa [#allocation7], 0 }
   0x2   :  { %20 = vsyncpa [#allocation10], 0 }
   0x3   :  { %21 = vsyncpa [#allocation13], 0 }
   0x4   :  { %22 = vsyncpa [#allocation5], 0 }
   0x5   :  { %23 = vsyncpa [#allocation17], 0  ;;  %s2882_s21 = smov [#allocation6]   ;;  %s2883_s23 = smov [#allocation9]  }
   0x6   :  { %s43_s22 = sshll.u32 %s2882_s21, 4  ;;  %s71_s24 = sshll.u32 %s2883_s23, 4  ;;  %s44_s22 = int_to_ptr.vmem [resolvable:$true] %s43_s22  ;;  %s72_s24 = int_to_ptr.vmem [resolvable:$true] %s71_s24 }
   0x7   :  { %s2698_s25 = scalar_lea.vmem %s44_s22, 9216  ;;  %p2703_p1 = scmp.lt.s32.totalorder %s44_s22, %s44_s22 }
   0x8   :  { %p2699_p0 = scmp.ne.s32.totalorder %s44_s22, %s2698_s25  ;;  %p2704_p2 = scmp.lt.s32.totalorder %s2698_s25, %s2698_s25 }
   0xa   :  { %p2705_p3 = por %p2704_p2, %p2703_p1 }
   0xc   :  { %p2706_p4 = pnand %p2705_p3, %p2699_p0 }
   0xe   :  { %2709 = shalt.err (!%p2706_p4)
}
   0xf   :  { %s2884_s26 = smov 64   ;;  %s2885_s27 = smov 4  }
  0x10   :  { %49 = dma.hbm_to_vmem [thread:$0]  %s3359_s2, 9216, %s44_s22, [#allocation7], %s2884_s26, %s2884_s26, %s2885_s27  }
  0x11   :  { %s2718_s30 = scalar_lea.vmem %s72_s24, 1024  ;;  %p2723_p6 = scmp.lt.s32.totalorder %s72_s24, %s72_s24 }
  0x12   :  { %p2719_p5 = scmp.ne.s32.totalorder %s72_s24, %s2718_s30  ;;  %p2724_p7 = scmp.lt.s32.totalorder %s2718_s30, %s2718_s30 }
  0x14   :  { %p2725_p8 = por %p2724_p7, %p2723_p6 }
  0x16   :  { %p2726_p9 = pnand %p2725_p8, %p2719_p5 }
  0x18   :  { %2729 = shalt.err (!%p2726_p9)
}
  0x19   :  { %77 = dma.hbm_to_vmem [thread:$0]  %s3364_s7, 1024, %s72_s24, [#allocation10], %s2884_s26, %s2884_s26, %s2885_s27  }
  0x1a   :  { %s2886_s15 = smov [#allocation12]   ;;  %s2887_s17 = smov [#allocation3]  }
  0x1b   :  { %s95_s16 = sshll.u32 %s2886_s15, 4  ;;  %s31_s18 = sshll.u32 %s2887_s17, 4  ;;  %s96_s16 = int_to_ptr.vmem [resolvable:$true] %s95_s16  ;;  %s32_s18 = int_to_ptr.vmem [resolvable:$true] %s31_s18 }
  0x1c   :  { %s2738_s2 = scalar_lea.vmem %s96_s16, 1024  ;;  %p2743_p11 = scmp.lt.s32.totalorder %s96_s16, %s96_s16 }
  0x1d   :  { %p2739_p10 = scmp.ne.s32.totalorder %s96_s16, %s2738_s2  ;;  %p2744_p12 = scmp.lt.s32.totalorder %s2738_s2, %s2738_s2 }
  0x1f   :  { %p2745_p13 = por %p2744_p12, %p2743_p11 }
  0x21   :  { %p2746_p0 = pnand %p2745_p13, %p2739_p10 }
  0x23   :  { %2749 = shalt.err (!%p2746_p0)
}
  0x24   :  { %101 = dma.hbm_to_vmem [thread:$0]  %s3366_s9, 1024, %s96_s16, [#allocation13], %s2884_s26, %s2884_s26, %s2885_s27  }
  0x25   :  { %s2758_s7 = scalar_lea.vmem %s32_s18, 128  ;;  %p2763_p2 = scmp.lt.s32.totalorder %s32_s18, %s32_s18 }
  0x26   :  { %p2759_p1 = scmp.ne.s32.totalorder %s32_s18, %s2758_s7  ;;  %p2764_p3 = scmp.lt.s32.totalorder %s2758_s7, %s2758_s7 }
  0x28   :  { %p2765_p4 = por %p2764_p3, %p2763_p2 }
  0x2a   :  { %p2766_p5 = pnand %p2765_p4, %p2759_p1 }
  0x2c   :  { %2769 = shalt.err (!%p2766_p5)
}
  0x2d   :  { %37 = dma.hbm_to_vmem [thread:$0]  %s3358_s1, 128, %s32_s18, [#allocation4], %s2884_s26, %s2884_s26, %s2885_s27  }
  0x2e   :  { %s2888_s23 = smov [#allocation8]   ;;  %s2889_s25 = smov [#allocation11]  }
  0x2f   :  { %s56_s24 = sshll.u32 %s2888_s23, 4  ;;  %s83_s28 = sshll.u32 %s2889_s25, 4  ;;  %s57_s24 = int_to_ptr.vmem [resolvable:$true] %s56_s24  ;;  %s84_s28 = int_to_ptr.vmem [resolvable:$true] %s83_s28 }
  0x30   :  { %s2778_s9 = scalar_lea.vmem %s57_s24, 128  ;;  %p2783_p7 = scmp.lt.s32.totalorder %s57_s24, %s57_s24 }
  0x31   :  { %p2779_p6 = scmp.ne.s32.totalorder %s57_s24, %s2778_s9  ;;  %p2784_p8 = scmp.lt.s32.totalorder %s2778_s9, %s2778_s9 }
  0x33   :  { %p2785_p9 = por %p2784_p8, %p2783_p7 }
  0x35   :  { %p2786_p10 = pnand %p2785_p9, %p2779_p6 }
  0x37   :  { %2789 = shalt.err (!%p2786_p10)
}
  0x38   :  { %59 = dma.hbm_to_vmem [thread:$0]  %s3360_s3, 128, %s57_s24, [#allocation7]  }
  0x39   :  { %s2798_s13 = scalar_lea.vmem %s84_s28, 1024  ;;  %p2803_p12 = scmp.lt.s32.totalorder %s84_s28, %s84_s28 }
  0x3a   :  { %p2799_p11 = scmp.ne.s32.totalorder %s84_s28, %s2798_s13  ;;  %p2804_p13 = scmp.lt.s32.totalorder %s2798_s13, %s2798_s13 }
  0x3c   :  { %p2805_p0 = por %p2804_p13, %p2803_p12 }
  0x3e   :  { %p2806_p1 = pnand %p2805_p0, %p2799_p11 }
  0x40   :  { %2809 = shalt.err (!%p2806_p1)
}
  0x41   :  { %89 = dma.hbm_to_vmem [thread:$0]  %s3365_s8, 1024, %s84_s28, [#allocation10], %s2884_s26, %s2884_s26, %s2885_s27  }
  0x42   :  { %s2890_s15 = smov [#allocation14]  }
  0x43   :  { %s107_s16 = sshll.u32 %s2890_s15, 4  ;;  %s108_s16 = int_to_ptr.vmem [resolvable:$true] %s107_s16 }
  0x44   :  { %s2818_s17 = scalar_lea.vmem %s108_s16, 1024  ;;  %p2823_p3 = scmp.lt.s32.totalorder %s108_s16, %s108_s16 }
  0x45   :  { %p2819_p2 = scmp.ne.s32.totalorder %s108_s16, %s2818_s17  ;;  %p2824_p4 = scmp.lt.s32.totalorder %s2818_s17, %s2818_s17 }
  0x47   :  { %p2825_p5 = por %p2824_p4, %p2823_p3 }
  0x49   :  { %p2826_p6 = pnand %p2825_p5, %p2819_p2 }
  0x4b   :  { %2829 = shalt.err (!%p2826_p6)
}
  0x4c   :  { %113 = dma.hbm_to_vmem [thread:$0]  %s3367_s10, 1024, %s108_s16, [#allocation13], %s2884_s26, %s2884_s26, %s2885_s27  }
  0x4d   :  { %2870 = dma.done.wait [#allocation4], 128  }
  0x4e   :  { %2871 = vsyncadd [#allocation4], 4294967168 }
  0x4f   :  { %2872 = dma.done.wait [#allocation7], 9344  }
  0x50   :  { %2873 = vsyncadd [#allocation7], 4294957952 }
  0x51   :  { %2874 = dma.done.wait [#allocation10], 2048  }
  0x52   :  { %2875 = vsyncadd [#allocation10], 4294965248 }
  0x53   :  { %2876 = dma.done.wait [#allocation13], 2048  }
  0x54   :  { %2877 = vsyncadd [#allocation13], 4294965248  ;;  %v2562_v0 = vld [vmem:[#allocation6 + $0x78] sm:$0xff]   ;;  %v2566_v4 = vld [vmem:[#allocation6 + $0x70] sm:$0xff]   ;;  %vm2892_vm0 = vmmov 0   ;;  %vm1027_vm1 = vcmask 1041409  }
  0x55   :  { %v2563_v1 = vld [vmem:[#allocation6 + $0xf8] sm:$0xff]   ;;  %2148 = vmatprep.subr.bf16.mxu0 %v2562_v0  ;;  %v2567_v5 = vld [vmem:[#allocation6 + $0xf0] sm:$0xff]   ;;  %v2570_v8 = vld [vmem:[#allocation6 + $0x68] sm:$0xff]   ;;  %vm1105_vm2 = vcmask 261120   ;;  %s2895_s16 = smov [#allocation16]  }
  0x56   :  { %v2564_v2 = vld [vmem:[#allocation6 + $0x38] sm:$0xff]   ;;  %2170 = vmatprep.subr.bf16.mxu1 %v2563_v1  ;;  %v2568_v6 = vld [vmem:[#allocation6 + $0x30] sm:$0xff]   ;;  %v2571_v9 = vld [vmem:[#allocation6 + $0xe8] sm:$0xff]  }
  0x57   :  { %v2565_v3 = vld [vmem:[#allocation6 + $0xb8] sm:$0xff]   ;;  %2149 = vmatpush3.bf16.msra.mxu0 %v2564_v2  ;;  %v2569_v7 = vld [vmem:[#allocation6 + $0xb0] sm:$0xff]   ;;  %v2572_v10 = vld [vmem:[#allocation6 + $0x28] sm:$0xff]  }
  0x58   :  { %2171 = vmatpush3.bf16.msra.mxu1 %v2565_v3  ;;  %2150 = vmatprep.subr.bf16.mxu0 %v2566_v4  ;;  %v2573_v11 = vld [vmem:[#allocation6 + $0xa8] sm:$0xff]   ;;  %v2574_v12 = vld [vmem:[#allocation6 + $0x60] sm:$0xff]   ;;  %v2578_v16 = vld [vmem:[#allocation6 + $0x58] sm:$0xff]  }
  0x59   :  { %2172 = vmatprep.subr.bf16.mxu1 %v2567_v5  ;;  %v2575_v13 = vld [vmem:[#allocation6 + $0xe0] sm:$0xff]   ;;  %v2579_v17 = vld [vmem:[#allocation6 + $0xd8] sm:$0xff]   ;;  %v2582_v20 = vld [vmem:[#allocation6 + $0x50] sm:$0xff]  }
  0x5a   :  { %v2576_v14 = vld [vmem:[#allocation6 + $0x20] sm:$0xff]   ;;  %v2580_v18 = vld [vmem:[#allocation6 + $0x18] sm:$0xff]   ;;  %v2583_v21 = vld [vmem:[#allocation6 + $0xd0] sm:$0xff]  }
  0x5b   :  { %2151 = vmatpush3.bf16.msra.mxu0 %v2568_v6  ;;  %v2577_v15 = vld [vmem:[#allocation6 + $0xa0] sm:$0xff]   ;;  %v2581_v19 = vld [vmem:[#allocation6 + $0x98] sm:$0xff]   ;;  %v2584_v22 = vld [vmem:[#allocation6 + $0x10] sm:$0xff]   ;;  %v2891_v6 = vmov 0.0  }
  0x5c   :  { %2173 = vmatpush3.bf16.msra.mxu1 %v2569_v7  ;;  %2152 = vmatprep.subr.bf16.mxu0 %v2570_v8  ;;  %v2585_v23 = vld [vmem:[#allocation6 + $0x90] sm:$0xff]   ;;  %v2586_v24 = vld [vmem:[#allocation6 + $0x48] sm:$0xff]   ;;  %v2590_v28 = vld [vmem:[#allocation6 + $0x40] sm:$0xff]  }
  0x5d   :  { %2174 = vmatprep.subr.bf16.mxu1 %v2571_v9  ;;  %v2587_v25 = vld [vmem:[#allocation6 + $0xc8] sm:$0xff]   ;;  %v2591_v29 = vld [vmem:[#allocation6 + $0xc0] sm:$0xff]   ;;  %v2594_v32 = vld [vmem:[%s3357_s0] ss:$36 sps:$4 sm:$0xff]  }
  0x5e   :  { %v2588_v26 = vld [vmem:[#allocation6 + $0x8] sm:$0xff]   ;;  %v2592_v30 = vld [vmem:[#allocation6] sm:$0xff]   ;;  %v2600_v36 = vld [vmem:[#allocation6 + $0x178] sm:$0xff]  }
  0x5f   :  { %2153 = vmatpush3.bf16.msra.mxu0 %v2572_v10  ;;  %v2589_v27 = vld [vmem:[#allocation6 + $0x88] sm:$0xff]   ;;  %v2593_v31 = vld [vmem:[#allocation6 + $0x80] sm:$0xff]   ;;  %v2601_v37 = vld [vmem:[#allocation6 + $0x138] sm:$0xff]  }
  0x60   :  { %2175 = vmatpush3.bf16.msra.mxu1 %v2573_v11  ;;  %2154 = vmatprep.subr.bf16.mxu0 %v2574_v12  ;;  %v2596_v33 = vld [vmem:[%s3357_s0 + $0x4] ss:$36 sps:$4 sm:$0xff]   ;;  %v2599_v35 = vld [vmem:[%s3357_s0 + $0xc] ss:$36 sps:$4 sm:$0xff]   ;;  %v2604_v40 = vld [vmem:[#allocation6 + $0x170] sm:$0xff]  }
  0x61   :  { %2176 = vmatprep.subr.bf16.mxu1 %v2575_v13  ;;  %v2597_v34 = vld [vmem:[%s3357_s0 + $0x8] ss:$36 sps:$4 sm:$0xff]   ;;  %808 = vmatprep.mubr.bf16.mxu0 %v2596_v33  ;;  %v2602_v38 = vld [vmem:[#allocation6 + $0x1f8] sm:$0xff]   ;;  %v2605_v41 = vld [vmem:[#allocation6 + $0x130] sm:$0xff]  }
  0x62   :  { %849 = vmatprep.mubr.bf16.mxu1 %v2599_v35  ;;  %v2603_v39 = vld [vmem:[#allocation6 + $0x1b8] sm:$0xff]   ;;  %v2606_v42 = vld [vmem:[#allocation6 + $0x1f0] sm:$0xff]   ;;  %v2608_v44 = vld [vmem:[#allocation6 + $0x168] sm:$0xff]  }
  0x63   :  { %2155 = vmatpush3.bf16.msra.mxu0 %v2576_v14  ;;  %v2607_v43 = vld [vmem:[#allocation6 + $0x1b0] sm:$0xff]   ;;  %v2609_v45 = vld [vmem:[#allocation6 + $0x128] sm:$0xff]   ;;  %v2612_v48 = vld [vmem:[#allocation6 + $0x160] sm:$0xff]  }
  0x64   :  { %2177 = vmatpush3.bf16.msra.mxu1 %v2577_v15  ;;  %2156 = vmatprep.subr.bf16.mxu0 %v2578_v16  ;;  %v2610_v46 = vld [vmem:[#allocation6 + $0x1e8] sm:$0xff]   ;;  %v2613_v49 = vld [vmem:[#allocation6 + $0x120] sm:$0xff]   ;;  %v2616_v52 = vld [vmem:[#allocation6 + $0x158] sm:$0xff]  }
  0x65   :  { %2178 = vmatprep.subr.bf16.mxu1 %v2579_v17  ;;  %v2611_v47 = vld [vmem:[#allocation6 + $0x1a8] sm:$0xff]   ;;  %v2614_v50 = vld [vmem:[#allocation6 + $0x1e0] sm:$0xff]   ;;  %v2617_v53 = vld [vmem:[#allocation6 + $0x118] sm:$0xff]  }
  0x66   :  { %v2615_v51 = vld [vmem:[#allocation6 + $0x1a0] sm:$0xff]   ;;  %v2618_v54 = vld [vmem:[#allocation6 + $0x1d8] sm:$0xff]   ;;  %v2620_v56 = vld [vmem:[#allocation6 + $0x150] sm:$0xff]  }
  0x67   :  { %2157 = vmatpush3.bf16.msra.mxu0 %v2580_v18  ;;  %v2619_v55 = vld [vmem:[#allocation6 + $0x198] sm:$0xff]   ;;  %v2621_v57 = vld [vmem:[#allocation6 + $0x110] sm:$0xff]   ;;  %v2624_v60 = vld [vmem:[#allocation6 + $0x148] sm:$0xff]  }
  0x68   :  { %2179 = vmatpush3.bf16.msra.mxu1 %v2581_v19  ;;  %2158 = vmatprep.subr.bf16.mxu0 %v2582_v20  ;;  %v2622_v58 = vld [vmem:[#allocation6 + $0x1d0] sm:$0xff]   ;;  %v2625_v61 = vld [vmem:[#allocation6 + $0x108] sm:$0xff]   ;;  %v2628_v0 = vld [vmem:[#allocation6 + $0x140] sm:$0xff]  }
  0x69   :  { %2180 = vmatprep.subr.bf16.mxu1 %v2583_v21  ;;  %v2623_v59 = vld [vmem:[#allocation6 + $0x190] sm:$0xff]   ;;  %v2626_v62 = vld [vmem:[#allocation6 + $0x1c8] sm:$0xff]   ;;  %v2629_v1 = vld [vmem:[#allocation6 + $0x100] sm:$0xff]  }
  0x6a   :  { %v2627_v63 = vld [vmem:[#allocation6 + $0x188] sm:$0xff]   ;;  %v2630_v2 = vld [vmem:[#allocation6 + $0x1c0] sm:$0xff]   ;;  %v2635_v7 = vld [vmem:[%s3357_s0 + $0x18] ss:$36 sps:$4 sm:$0xff]  }
  0x6b   :  { %2159 = vmatpush3.bf16.msra.mxu0 %v2584_v22  ;;  %v2631_v3 = vld [vmem:[%s3357_s0 + $0x10] ss:$36 sps:$4 sm:$0xff]   ;;  %v2634_v5 = vld [vmem:[#allocation6 + $0x180] sm:$0xff]   ;;  %v2637_v8 = vld [vmem:[%s3357_s0 + $0x1c] ss:$36 sps:$4 sm:$0xff]  }
  0x6c   :  { %2181 = vmatpush3.bf16.msra.mxu1 %v2585_v23  ;;  %2160 = vmatprep.subr.bf16.mxu0 %v2586_v24  ;;  %v2633_v4 = vld [vmem:[%s3357_s0 + $0x14] ss:$36 sps:$4 sm:$0xff]   ;;  %v2638_v9 = vld [vmem:[#allocation6 + $0x238] sm:$0xff]   ;;  %v2641_v12 = vld [vmem:[#allocation6 + $0x220] sm:$0xff]  }
  0x6d   :  { %2182 = vmatprep.subr.bf16.mxu1 %v2587_v25  ;;  %v2639_v10 = vld [vmem:[#allocation6 + $0x230] sm:$0xff]   ;;  %v2640_v11 = vld [vmem:[#allocation6 + $0x228] sm:$0xff]   ;;  %v2642_v13 = vld [vmem:[#allocation6 + $0x218] sm:$0xff]  }
  0x6e   :  { %v2643_v14 = vld [vmem:[#allocation6 + $0x210] sm:$0xff]   ;;  %v2644_v15 = vld [vmem:[#allocation6 + $0x208] sm:$0xff]   ;;  %v2645_v16 = vld [vmem:[#allocation6 + $0x200] sm:$0xff]  }
  0x6f   :  { %2161 = vmatpush3.bf16.msra.mxu0 %v2588_v26  ;;  %v2646_v17 = vld [vmem:[%s3357_s0 + $0x20] ss:$36 sps:$4 sm:$0xff]   ;;  %v3048_v18 = vld [vmem:[%s3361_s4 + $0x78] sm:$0xff]  ;;  %v3053_v19 = vld [vmem:[%s3361_s4 + $0x70] sm:$0xff]  ;;  %s2005_s0 = sshll.u32 %s2895_s16, 4  ;;  %s2006_s0 = int_to_ptr.vmem [resolvable:$true] %s2005_s0 }
  0x70   :  { %2183 = vmatpush3.bf16.msra.mxu1 %v2589_v27  ;;  %2162 = vmatprep.subr.bf16.mxu0 %v2590_v28  ;;  %v3060_v20 = vld [vmem:[%s3361_s4 + $0x68] sm:$0xff]  ;;  %v3067_v21 = vld [vmem:[%s3361_s4 + $0x60] sm:$0xff]  ;;  %v3074_v22 = vld [vmem:[%s3361_s4 + $0x58] sm:$0xff] }
  0x71   :  { %2184 = vmatprep.subr.bf16.mxu1 %v2591_v29  ;;  %v3083_v23 = vld [vmem:[%s3361_s4 + $0x50] sm:$0xff]  ;;  %v3090_v24 = vld [vmem:[%s3361_s4 + $0x48] sm:$0xff]  ;;  %v3097_v25 = vld [vmem:[%s3361_s4 + $0x40] sm:$0xff] }
  0x72   :  { %v3104_v26 = vld [vmem:[%s3361_s4 + $0x38] sm:$0xff]  ;;  %v3111_v27 = vld [vmem:[%s3361_s4 + $0x30] sm:$0xff]  ;;  %v3118_v28 = vld [vmem:[%s3361_s4 + $0x28] sm:$0xff] }
  0x73   :  { %2163 = vmatpush3.bf16.msra.mxu0 %v2592_v30  ;;  %v3125_v29 = vld [vmem:[%s3361_s4 + $0x20] sm:$0xff]  ;;  %v3132_v30 = vld [vmem:[%s3361_s4 + $0x18] sm:$0xff]  ;;  %v3166_v35 = vld [vmem:[%s3362_s5 + $0x10] sm:$0xff] }
  0x74   :  { %2185 = vmatpush3.bf16.msra.mxu1 %v2593_v31  ;;  %2192 = vmatprep.subr.bf16.mxu0 %v2600_v36  ;;  %v3138_v31 = vld [vmem:[%s3361_s4 + $0x10] sm:$0xff]  ;;  %v3151_v33 = vld [vmem:[%s3361_s4] sm:$0xff] }
  0x75   :  { %2214 = vmatprep.subr.bf16.mxu1 %v2602_v38 }
  0x76   :  { %809 = vmatmul.mubr.bf16.vlgmr.msra.gmra.mxu0 %v2594_v32  ;;  %v3144_v32 = vld [vmem:[%s3361_s4 + $0x8] sm:$0xff] }
  0x77   :  { %850 = vmatmul.mubr.bf16.vlgmr.msra.gmra.mxu1 %v2597_v34  ;;  %2193 = vmatpush3.bf16.msra.mxu0 %v2601_v37  ;;  %v3160_v34 = vld [vmem:[%s3362_s5 + $0x18] sm:$0xff] }
  0x78   :  { %2215 = vmatpush3.bf16.msra.mxu1 %v2603_v39  ;;  %2194 = vmatprep.subr.bf16.mxu0 %v2604_v40 }
  0x79   :  { %2216 = vmatprep.subr.bf16.mxu1 %v2606_v42  ;;  %890 = vmatprep.mubr.bf16.mxu0 %v2633_v4 }
  0x7a   :  { %931 = vmatprep.mubr.bf16.mxu1 %v2637_v8 }
  0x7b   :  { %2195 = vmatpush3.bf16.msra.mxu0 %v2605_v41 }
  0x7c   :  { %2217 = vmatpush3.bf16.msra.mxu1 %v2607_v43  ;;  %2196 = vmatprep.subr.bf16.mxu0 %v2608_v44 }
  0x7d   :  { %2218 = vmatprep.subr.bf16.mxu1 %v2610_v46 }
  0x7f   :  { %2197 = vmatpush3.bf16.msra.mxu0 %v2609_v45 }
  0x80   :  { %2219 = vmatpush3.bf16.msra.mxu1 %v2611_v47  ;;  %2198 = vmatprep.subr.bf16.mxu0 %v2612_v48  ;;  %v991_v47 = vlaneseq }
  0x81   :  { %2220 = vmatprep.subr.bf16.mxu1 %v2614_v50 }
  0x83   :  { %2199 = vmatpush3.bf16.msra.mxu0 %v2613_v49 }
  0x84   :  { %2221 = vmatpush3.bf16.msra.mxu1 %v2615_v51  ;;  %2200 = vmatprep.subr.bf16.mxu0 %v2616_v52 }
  0x85   :  { %2222 = vmatprep.subr.bf16.mxu1 %v2618_v54 }
  0x87   :  { %2201 = vmatpush3.bf16.msra.mxu0 %v2617_v53  ;;  %v3171_v53 = vshrl.u32 %v991_v47, 7  ;;  %v1102_v47 = vld [vmem:[%s3362_s5 + $0x8] sm:$0xff] }
  0x88   :  { %2223 = vmatpush3.bf16.msra.mxu1 %v2619_v55  ;;  %2202 = vmatprep.subr.bf16.mxu0 %v2620_v56 }
  0x89   :  { %2224 = vmatprep.subr.bf16.mxu1 %v2622_v58 }
  0x8b   :  { %2203 = vmatpush3.bf16.msra.mxu0 %v2621_v57 }
  0x8c   :  { %2225 = vmatpush3.bf16.msra.mxu1 %v2623_v59  ;;  %2204 = vmatprep.subr.bf16.mxu0 %v2624_v60 }
  0x8d   :  { %2226 = vmatprep.subr.bf16.mxu1 %v2626_v62  ;;  %v3174_v62 = vsub.s32 0, %v3171_v53 }
  0x8f   :  { %2205 = vmatpush3.bf16.msra.mxu0 %v2625_v61 }
  0x90   :  { %2227 = vmatpush3.bf16.msra.mxu1 %v2627_v63  ;;  %2206 = vmatprep.subr.bf16.mxu0 %v2628_v0  ;;  %v3176_v0 = vld [vmem:[#allocation8] sm:$0xff] }
  0x91   :  { %2228 = vmatprep.subr.bf16.mxu1 %v2630_v2 }
  0x93   :  { %2207 = vmatpush3.bf16.msra.mxu0 %v2629_v1 }
  0x94   :  { %2334 = vmatprep.subr.bf16.mxu0 %v2891_v6  ;;  %2229 = vmatpush3.bf16.msra.mxu1 %v2634_v5  ;;  %v994_v5 = vrot.slane %v3176_v0, %v3174_v62 }
  0x95   :  { %2354 = vmatprep.subr.mxu1 %v2891_v6 }
  0x96   :  { %891 = vmatmul.mubr.bf16.vlgmr.msra.gmra.mxu0 %v2631_v3 }
  0x97   :  { %2350 = vmatprep.mubr.msk.bf16.mxu0 %vm2892_vm0, %v2891_v6  ;;  %2335 = vmatpush3.bf16.msra.mxu0 %v2638_v9 }
  0x98   :  { %932 = vmatmul.mubr.bf16.vlgmr.msra.gmra.mxu1 %v2635_v7  ;;  %2336 = vmatprep.subr.bf16.mxu0 %v2891_v6 }
  0x99   :  { %2386 = vmatprep.mubr.msk.f32.mxu1 %vm2892_vm0, %v2891_v6  ;;  %2355 = vmatpush3.msra.mxu1 %v3048_v18 }
  0x9a   :  { %2356 = vmatprep.subr.mxu1 %v2891_v6 }
  0x9b   :  { %2337 = vmatpush3.bf16.msra.mxu0 %v2639_v10  ;;  %2357 = vmatpush3.msra.mxu1 %v3053_v19 }
  0x9c   :  { %2338 = vmatprep.subr.bf16.mxu0 %v2891_v6  ;;  %2358 = vmatprep.subr.mxu1 %v2891_v6 }
  0x9d   :  { %2359 = vmatpush3.msra.mxu1 %v3060_v20 }
  0x9e   :  { %2360 = vmatprep.subr.mxu1 %v2891_v6 }
  0x9f   :  { %2339 = vmatpush3.bf16.msra.mxu0 %v2640_v11  ;;  %2361 = vmatpush3.msra.mxu1 %v3067_v21 }
  0xa0   :  { %2340 = vmatprep.subr.bf16.mxu0 %v2891_v6  ;;  %2362 = vmatprep.subr.mxu1 %v2891_v6 }
  0xa1   :  { %2363 = vmatpush3.msra.mxu1 %v3074_v22 }
  0xa2   :  { %2364 = vmatprep.subr.mxu1 %v2891_v6 }
  0xa3   :  { %2341 = vmatpush3.bf16.msra.mxu0 %v2641_v12  ;;  %2365 = vmatpush3.msra.mxu1 %v3083_v23 }
  0xa4   :  { %2342 = vmatprep.subr.bf16.mxu0 %v2891_v6  ;;  %2366 = vmatprep.subr.mxu1 %v2891_v6 }
  0xa5   :  { %2367 = vmatpush3.msra.mxu1 %v3090_v24 }
  0xa6   :  { %2368 = vmatprep.subr.mxu1 %v2891_v6 }
  0xa7   :  { %2343 = vmatpush3.bf16.msra.mxu0 %v2642_v13  ;;  %2369 = vmatpush3.msra.mxu1 %v3097_v25 }
  0xa8   :  { %2344 = vmatprep.subr.bf16.mxu0 %v2891_v6  ;;  %2370 = vmatprep.subr.mxu1 %v2891_v6 }
  0xa9   :  { %2371 = vmatpush3.msra.mxu1 %v3104_v26 }
  0xaa   :  { %2372 = vmatprep.subr.mxu1 %v2891_v6 }
  0xab   :  { %2345 = vmatpush3.bf16.msra.mxu0 %v2643_v14  ;;  %2373 = vmatpush3.msra.mxu1 %v3111_v27 }
  0xac   :  { %2346 = vmatprep.subr.bf16.mxu0 %v2891_v6  ;;  %2374 = vmatprep.subr.mxu1 %v2891_v6 }
  0xad   :  { %2375 = vmatpush3.msra.mxu1 %v3118_v28 }
  0xae   :  { %2376 = vmatprep.subr.mxu1 %v2891_v6 }
  0xaf   :  { %2347 = vmatpush3.bf16.msra.mxu0 %v2644_v15  ;;  %2377 = vmatpush3.msra.mxu1 %v3125_v29 }
  0xb0   :  { %2348 = vmatprep.subr.bf16.mxu0 %v2891_v6  ;;  %2378 = vmatprep.subr.mxu1 %v2891_v6 }
  0xb1   :  { %2379 = vmatpush3.msra.mxu1 %v3132_v30 }
  0xb2   :  { %2380 = vmatprep.subr.mxu1 %v2891_v6 }
  0xb3   :  { %2349 = vmatpush3.bf16.msra.mxu0 %v2645_v16  ;;  %2381 = vmatpush3.msra.mxu1 %v3138_v31 }
  0xb4   :  { %2435 = vmatprep.subr.mxu0 %v2891_v6  ;;  %2382 = vmatprep.subr.mxu1 %v2891_v6 }
  0xb5   :  { %2383 = vmatpush3.msra.mxu1 %v3144_v32 }
  0xb6   :  { %2351 = vmatmul.mubr.bf16.vlgmr.msra.gmra.mxu0 %v2646_v17  ;;  %2384 = vmatprep.subr.mxu1 %v2891_v6 }
  0xb7   :  { %2443 = vmatprep.mubr.msk.f32.mxu0 %vm2892_vm0, %v2891_v6  ;;  %2385 = vmatpush3.msra.mxu1 %v3151_v33 }
  0xb8   :  { %2389 = vmatprep.subr.mxu1 %v2891_v6  ;;  %2436 = vmatpush3.msra.mxu0 %v3160_v34 }
  0xb9   :  { %2437 = vmatprep.subr.mxu0 %v2891_v6 }
  0xba   :  { %2438 = vmatpush3.msra.mxu0 %v3166_v35 }
  0xbb   :  { %2439 = vmatprep.subr.mxu0 %v2891_v6 }
  0xbc   :  { %2440 = vmatpush3.msra.mxu0 %v1102_v47 }
  0xbd   :  { %2441 = vmatprep.subr.mxu0 %v2891_v6 }
 0x136   :  { %v2164_v36 = vpop.f32.mrf.mxu0 }
 0x137   :  { %v2186_v37 = vpop.f32.mrf.mxu1 }
 0x138   :  { %v2165_v38 = vpop.f32.mrf.mxu0 }
 0x139   :  { %v2187_v39 = vpop.f32.mrf.mxu1  ;;  %v2166_v50 = vadd.f32 %v2165_v38, %v2164_v36 }
 0x13a   :  { %v2167_v40 = vpop.f32.mrf.mxu0  ;;  %v2188_v51 = vadd.f32 %v2187_v39, %v2186_v37 }
 0x13b   :  { %v2189_v41 = vpop.f32.mrf.mxu1 }
 0x13c   :  { %v2168_v42 = vpop.f32.mrf.mxu0  ;;  %v852_v56 = vadd.f32 %v2188_v51, %v2166_v50 }
 0x13d   :  { %v2190_v44 = vpop.f32.mrf.mxu1  ;;  %v2169_v57 = vadd.f32 %v2168_v42, %v2167_v40 }
 0x13e   :  { %v2191_v58 = vadd.f32 %v2190_v44, %v2189_v41 }
 0x140   :  { %v855_v1 = vadd.f32 %v2191_v58, %v2169_v57 }
 0x156   :  { %v2208_v43 = vpop.f32.mrf.mxu0 }
 0x158   :  { %v2209_v45 = vpop.f32.mrf.mxu0  ;;  %v2230_v46 = vpop.f32.mrf.mxu1 }
 0x159   :  { %v2210_v52 = vadd.f32 %v2209_v45, %v2208_v43 }
 0x15a   :  { %v2211_v48 = vpop.f32.mrf.mxu0  ;;  %v2231_v49 = vpop.f32.mrf.mxu1 }
 0x15b   :  { %v893_v59 = vadd.f32 %v2210_v52, %v852_v56  ;;  %v2232_v60 = vadd.f32 %v2231_v49, %v2230_v46 }
 0x15c   :  { %v2212_v54 = vpop.f32.mrf.mxu0  ;;  %v2233_v55 = vpop.f32.mrf.mxu1 }
 0x15d   :  { %v2213_v61 = vadd.f32 %v2212_v54, %v2211_v48  ;;  %v934_v4 = vadd.f32 %v2232_v60, %v893_v59 }
 0x15e   :  { %v2234_v63 = vpop.f32.mrf.mxu1 }
 0x15f   :  { %v896_v2 = vadd.f32 %v2213_v61, %v855_v1  ;;  %v2235_v3 = vadd.f32 %v2234_v63, %v2233_v55 }
 0x161   :  { %v937_v11 = vadd.f32 %v2235_v3, %v896_v2  ;;  %v2649_v2 = vld [vmem:[%s3363_s6 + $0x38] sm:$0xff]   ;;  %v2651_v3 = vld [vmem:[%s3363_s6 + $0x30] sm:$0xff]  }
 0x176   :  { %v974_v7 = vpop.f32.mrf.mxu0 }
 0x177   :  { %v975_v8 = vadd.f32 %v974_v7, %v934_v4  ;;  %v2653_v4 = vld [vmem:[%s3363_s6 + $0x28] sm:$0xff]  }
 0x178   :  { %v2352_v9 = vpop.f32.mrf.mxu0 }
 0x179   :  { %v3180_v10 = vadd.f32 %v994_v5, %v975_v8 }
 0x17a   :  { %v977_v12 = vpop.f32.mrf.mxu0 }
 0x17b   :  { %v997_v13 = vrot.slane %v3180_v10, 4  ;;  %v978_v14 = vadd.f32 %v977_v12, %v937_v11  ;;  %v2648_v12 = vld [vmem:[#allocation9 + $0x30] sm:$0xff]  }
 0x17c   :  { %v2353_v15 = vpop.f32.mrf.mxu0 }
 0x17d   :  { %v998_v16 = vadd.f32 %v997_v13, %v3180_v10  ;;  %v3184_v17 = vadd.f32 %v994_v5, %v978_v14  ;;  %v2650_v13 = vld [vmem:[#allocation9 + $0x28] sm:$0xff]   ;;  %v2652_v14 = vld [vmem:[#allocation9 + $0x20] sm:$0xff]   ;;  %v2654_v15 = vld [vmem:[#allocation9 + $0x18] sm:$0xff]  }
 0x17f   :  { %v999_v36 = vrot.slane %v998_v16, 2  ;;  %v1003_v37 = vrot.slane %v3184_v17, 4 }
 0x181   :  { %v1000_v38 = vadd.f32 %v999_v36, %v998_v16  ;;  %v1004_v39 = vadd.f32 %v1003_v37, %v3184_v17  ;;  %v2655_v16 = vld [vmem:[%s3363_s6 + $0x20] sm:$0xff]   ;;  %v2657_v36 = vld [vmem:[%s3363_s6 + $0x18] sm:$0xff]  }
 0x182   :  { %v2658_v37 = vld [vmem:[#allocation9 + $0x8] sm:$0xff]  }
 0x183   :  { %v1005_v40 = vrot.slane %v1004_v39, 2  ;;  %v1001_v42 = vrot.slane %v1000_v38, 1 }
 0x185   :  { %v1006_v41 = vadd.f32 %v1005_v40, %v1004_v39  ;;  %v1002_v44 = vadd.f32 %v1001_v42, %v1000_v38  ;;  %v2659_v38 = vld [vmem:[%s3363_s6 + $0x10] sm:$0xff]   ;;  %v2661_v40 = vld [vmem:[%s3363_s6 + $0x8] sm:$0xff]   ;;  %v2663_v42 = vld [vmem:[%s3363_s6] sm:$0xff]   ;;  %s2894_s6 = smov [#allocation15]  }
 0x186   :  { %v2660_v39 = vld [vmem:[#allocation9] sm:$0xff]   ;;  %s1993_s15 = sshll.u32 %s2894_s6, 4  ;;  %s1994_s15 = int_to_ptr.vmem [resolvable:$true] %s1993_s15 }
 0x187   :  { %v1007_v43 = vrot.slane %v1006_v41, 1  ;;  %s2830_s17 = scalar_lea.vmem %s1994_s15, 256  ;;  %p2835_p8 = scmp.lt.s32.totalorder %s1994_s15, %s1994_s15 }
 0x188   :  { %p2831_p7 = scmp.ne.s32.totalorder %s1994_s15, %s2830_s17  ;;  %p2836_p9 = scmp.lt.s32.totalorder %s2830_s17, %s2830_s17 }
 0x189   :  { %v1008_v45 = vadd.f32 %v1007_v43, %v1006_v41  ;;  %v2662_v41 = vld [vmem:[#allocation3] sm:$0xff]   ;;  %v2664_v43 = vld [vmem:[#allocation11 + $0x38] sm:$0xff]  }
 0x18a   :  { %p2837_p10 = por %p2836_p9, %p2835_p8 }
 0x18b   :  { %v1028_v46 = vsel %vm1027_vm1, %v1008_v45, %v1002_v44  ;;  %v2665_v44 = vld [vmem:[#allocation11 + $0x30] sm:$0xff]   ;;  %v2666_v45 = vld [vmem:[#allocation11 + $0x28] sm:$0xff]  }
 0x18c   :  { %2387 = vmatmul.mubr.f32.vlgmr.msra.gmra.mxu1 %v1028_v46  ;;  %v2667_v46 = vld [vmem:[#allocation11 + $0x20] sm:$0xff]   ;;  %p2838_p11 = pnand %p2837_p10, %p2831_p7 }
 0x18d   :  { %2390 = vmatpush3.msra.mxu1 %v3160_v34  ;;  %2397 = vmatprep.mubr.msk.f32.mxu1 %vm2892_vm0, %v2891_v6  ;;  %v1101_v34 = vld [vmem:[%s3362_s5] sm:$0xff] }
 0x18e   :  { %2391 = vmatprep.subr.mxu1 %v2891_v6  ;;  %2442 = vmatpush3.msra.mxu0 %v1101_v34 }
 0x18f   :  { %2392 = vmatpush3.msra.mxu1 %v3166_v35  ;;  %2446 = vmatprep.subr.bf16.mxu0 %v2891_v6 }
 0x190   :  { %2393 = vmatprep.subr.mxu1 %v2891_v6 }
 0x191   :  { %2394 = vmatpush3.msra.mxu1 %v1102_v47  ;;  %v2668_v47 = vld [vmem:[#allocation11 + $0x18] sm:$0xff]  }
 0x192   :  { %2395 = vmatprep.subr.mxu1 %v2891_v6 }
 0x193   :  { %2396 = vmatpush3.msra.mxu1 %v1101_v34  ;;  %v1380_v34 = vsub.s32 1, %v3171_v53 }
 0x194   :  { %2400 = vmatprep.subr.mxu1 %v2891_v6 }
 0x24c   :  { %v1096_v35 = vpop.f32.mrf.mxu1 }
 0x24d   :  { %v1100_v48 = vmul.f32 0.03125, %v1096_v35  ;;  %v1381_v35 = vrot.slane %v3176_v0, %v1380_v34 }
 0x24e   :  { %v2388_v49 = vpop.f32.mrf.mxu1 }
 0x24f   :  { %2398 = vmatmul.mubr.msk.f32.vlgmr.msra.gmra.mxu1 %vm1105_vm2, %v1100_v48 }
 0x250   :  { %2401 = vmatpush3.msra.mxu1 %v3048_v18  ;;  %2432 = vmatprep.mubr.msk.f32.mxu1 %vm2892_vm0, %v2891_v6  ;;  %v2893_v18 = vmov 1966171168  }
 0x251   :  { %2402 = vmatprep.subr.mxu1 %v2891_v6 }
 0x252   :  { %2403 = vmatpush3.msra.mxu1 %v3053_v19  ;;  %v1181_v19 = vunpack.c.l.s4 %v2893_v18 }
 0x253   :  { %2404 = vmatprep.subr.mxu1 %v2891_v6 }
 0x254   :  { %2405 = vmatpush3.msra.mxu1 %v3060_v20  ;;  %v1182_v20 = vunpack.c.0.s8 %v1181_v19 }
 0x255   :  { %2406 = vmatprep.subr.mxu1 %v2891_v6 }
 0x256   :  { %2407 = vmatpush3.msra.mxu1 %v3067_v21  ;;  %v3241_v21 = vsub.s32 %v1182_v20, %v3171_v53  ;;  %v1420_v20 = vsub.s32 2, %v3171_v53 }
 0x257   :  { %2408 = vmatprep.subr.mxu1 %v2891_v6 }
 0x258   :  { %2409 = vmatpush3.msra.mxu1 %v3074_v22 }
 0x259   :  { %2410 = vmatprep.subr.mxu1 %v2891_v6 }
 0x25a   :  { %2411 = vmatpush3.msra.mxu1 %v3083_v23 }
 0x25b   :  { %2412 = vmatprep.subr.mxu1 %v2891_v6 }
 0x25c   :  { %2413 = vmatpush3.msra.mxu1 %v3090_v24 }
 0x25d   :  { %2414 = vmatprep.subr.mxu1 %v2891_v6 }
 0x25e   :  { %2415 = vmatpush3.msra.mxu1 %v3097_v25 }
 0x25f   :  { %2416 = vmatprep.subr.mxu1 %v2891_v6 }
 0x260   :  { %2417 = vmatpush3.msra.mxu1 %v3104_v26 }
 0x261   :  { %2418 = vmatprep.subr.mxu1 %v2891_v6 }
 0x262   :  { %2419 = vmatpush3.msra.mxu1 %v3111_v27 }
 0x263   :  { %2420 = vmatprep.subr.mxu1 %v2891_v6 }
 0x264   :  { %2421 = vmatpush3.msra.mxu1 %v3118_v28 }
 0x265   :  { %2422 = vmatprep.subr.mxu1 %v2891_v6 }
 0x266   :  { %2423 = vmatpush3.msra.mxu1 %v3125_v29 }
 0x267   :  { %2424 = vmatprep.subr.mxu1 %v2891_v6 }
 0x268   :  { %2425 = vmatpush3.msra.mxu1 %v3132_v30 }
 0x269   :  { %2426 = vmatprep.subr.mxu1 %v2891_v6 }
 0x26a   :  { %2427 = vmatpush3.msra.mxu1 %v3138_v31 }
 0x26b   :  { %2428 = vmatprep.subr.mxu1 %v2891_v6 }
 0x26c   :  { %2429 = vmatpush3.msra.mxu1 %v3144_v32 }
 0x26d   :  { %2430 = vmatprep.subr.mxu1 %v2891_v6 }
 0x26e   :  { %2431 = vmatpush3.msra.mxu1 %v3151_v33 }
 0x26f   :  { %2466 = vmatprep.subr.bf16.mxu1 %v2891_v6 }
 0x30f   :  { %v1175_v22 = vpop.f32.mrf.mxu1 }
 0x310   :  { %v1186_v23 = vrot.slane %v1175_v22, %v3241_v21 }
 0x311   :  { %v2399_v24 = vpop.f32.mrf.mxu1 }
 0x312   :  { %v1187_v25 = vcombine.high %v1186_v23, %v1186_v23  ;;  %v1194_v26 = vrot.slane %v1186_v23, %v3241_v21 }
 0x314   :  { %v1201_v27 = vrot.slane %v1187_v25, %v3241_v21  ;;  %v1205_v28 = vrot.slane %v1194_v26, %v3174_v62  ;;  %v1421_v26 = vrot.slane %v3176_v0, %v1420_v20  ;;  %v1895_v20 = vsub.s32 6, %v3171_v53 }
 0x316   :  { %v1209_v29 = vrot.slane %v1201_v27, %v3174_v62  ;;  %v3249_v30 = vsub.f32 %v3180_v10, %v1205_v28  ;;  %v2647_v10 = vld [vmem:[#allocation9 + $0x38] sm:$0xff]  }
 0x318   :  { %v3252_v31 = vsub.f32 %v3184_v17, %v1209_v29  ;;  %v1214_v32 = vmul.f32 %v3249_v30, %v3249_v30  ;;  %v2656_v17 = vld [vmem:[#allocation9 + $0x10] sm:$0xff]  }
 0x31a   :  { %v1215_v33 = vmul.f32 %v3252_v31, %v3252_v31  ;;  %v1216_v50 = vrot.slane %v1214_v32, 4 }
 0x31c   :  { %v1217_v51 = vadd.f32 %v1216_v50, %v1214_v32  ;;  %v1222_v52 = vrot.slane %v1215_v33, 4 }
 0x31e   :  { %v1218_v54 = vrot.slane %v1217_v51, 2  ;;  %v1223_v55 = vadd.f32 %v1222_v52, %v1215_v33 }
 0x320   :  { %v1219_v56 = vadd.f32 %v1218_v54, %v1217_v51  ;;  %v1224_v57 = vrot.slane %v1223_v55, 2 }
 0x322   :  { %v1220_v58 = vrot.slane %v1219_v56, 1  ;;  %v1225_v59 = vadd.f32 %v1224_v57, %v1223_v55  ;;  %v2669_v57 = vld [vmem:[#allocation11 + $0x10] sm:$0xff]  }
 0x324   :  { %v1226_v60 = vrot.slane %v1225_v59, 1  ;;  %v1221_v61 = vadd.f32 %v1220_v58, %v1219_v56  ;;  %v2674_v58 = vld [vmem:[#allocation12 + $0x30] sm:$0xff]  }
 0x326   :  { %v1227_v63 = vadd.f32 %v1226_v60, %v1225_v59  ;;  %v2676_v59 = vld [vmem:[#allocation12 + $0x28] sm:$0xff]   ;;  %v2678_v60 = vld [vmem:[#allocation12 + $0x20] sm:$0xff]  }
 0x328   :  { %v1230_v1 = vsel %vm1027_vm1, %v1227_v63, %v1221_v61  ;;  %v2680_v61 = vld [vmem:[#allocation12 + $0x18] sm:$0xff]   ;;  %v1647_v63 = vsub.s32 3, %v3171_v53 }
 0x329   :  { %2433 = vmatmul.mubr.f32.vlgmr.msra.gmra.mxu1 %v1230_v1 }
 0x32a   :  { %2482 = vmatprep.mubr.msk.bf16.mxu1 %vm2892_vm0, %v2891_v6  ;;  %2467 = vmatpush3.bf16.msra.mxu1 %v2649_v2 }
 0x32b   :  { %2468 = vmatprep.subr.bf16.mxu1 %v2891_v6 }
 0x32e   :  { %2469 = vmatpush3.bf16.msra.mxu1 %v2651_v3  ;;  %v1648_v3 = vrot.slane %v3176_v0, %v1647_v63 }
 0x32f   :  { %2470 = vmatprep.subr.bf16.mxu1 %v2891_v6 }
 0x332   :  { %2471 = vmatpush3.bf16.msra.mxu1 %v2653_v4 }
 0x333   :  { %2472 = vmatprep.subr.bf16.mxu1 %v2891_v6 }
 0x336   :  { %2473 = vmatpush3.bf16.msra.mxu1 %v2655_v16  ;;  %v2677_v16 = vld [vmem:[#allocation14 + $0x28] sm:$0xff]  }
 0x337   :  { %2474 = vmatprep.subr.bf16.mxu1 %v2891_v6 }
 0x33a   :  { %2475 = vmatpush3.bf16.msra.mxu1 %v2657_v36  ;;  %v2681_v36 = vld [vmem:[#allocation14 + $0x18] sm:$0xff]  }
 0x33b   :  { %2476 = vmatprep.subr.bf16.mxu1 %v2891_v6 }
 0x33e   :  { %2477 = vmatpush3.bf16.msra.mxu1 %v2659_v38  ;;  %v2683_v38 = vld [vmem:[#allocation14 + $0x10] sm:$0xff]  }
 0x33f   :  { %2478 = vmatprep.subr.bf16.mxu1 %v2891_v6 }
 0x342   :  { %2479 = vmatpush3.bf16.msra.mxu1 %v2661_v40  ;;  %v2685_v40 = vld [vmem:[#allocation14 + $0x8] sm:$0xff]  }
 0x343   :  { %2480 = vmatprep.subr.bf16.mxu1 %v2891_v6 }
 0x346   :  { %2481 = vmatpush3.bf16.msra.mxu1 %v2663_v42  ;;  %v2687_v42 = vld [vmem:[#allocation14] sm:$0xff]  }
 0x347   :  { %2506 = vmatprep.subr.bf16.mxu1 %v2891_v6 }
 0x3e9   :  { %v1298_v5 = vpop.f32.mrf.mxu1 }
 0x3ea   :  { %v1302_v7 = vmul.f32 0.03125, %v1298_v5 }
 0x3eb   :  { %v2434_v8 = vpop.f32.mrf.mxu1 }
 0x3ec   :  { %v1303_v9 = vadd.f32 1e-05, %v1302_v7 }
 0x3ee   :  { %2688 = vrsqrt.f32 %v1303_v9 }
 0x3fb   :  { %v2689_v11 = vpop.eup %2688 }
 0x3fc   :  { %2444 = vmatmul.mubr.msk.f32.vlgmr.msra.gmra.mxu0 %vm1105_vm2, %v2689_v11 }
 0x3fd   :  { %2447 = vmatpush3.bf16.msra.mxu0 %v2647_v10  ;;  %2462 = vmatprep.mubr.msk.bf16.mxu0 %vm2892_vm0, %v2891_v6 }
 0x3fe   :  { %2448 = vmatprep.subr.bf16.mxu0 %v2891_v6 }
 0x401   :  { %2449 = vmatpush3.bf16.msra.mxu0 %v2648_v12 }
 0x402   :  { %2450 = vmatprep.subr.bf16.mxu0 %v2891_v6 }
 0x405   :  { %2451 = vmatpush3.bf16.msra.mxu0 %v2650_v13  ;;  %v2673_v13 = vld [vmem:[#allocation14 + $0x38] sm:$0xff]  }
 0x406   :  { %2452 = vmatprep.subr.bf16.mxu0 %v2891_v6 }
 0x409   :  { %2453 = vmatpush3.bf16.msra.mxu0 %v2652_v14 }
 0x40a   :  { %2454 = vmatprep.subr.bf16.mxu0 %v2891_v6 }
 0x40d   :  { %2455 = vmatpush3.bf16.msra.mxu0 %v2654_v15  ;;  %v2675_v15 = vld [vmem:[#allocation14 + $0x30] sm:$0xff]  }
 0x40e   :  { %2456 = vmatprep.subr.bf16.mxu0 %v2891_v6 }
 0x411   :  { %2457 = vmatpush3.bf16.msra.mxu0 %v2656_v17  ;;  %v2679_v17 = vld [vmem:[#allocation14 + $0x20] sm:$0xff]  }
 0x412   :  { %2458 = vmatprep.subr.bf16.mxu0 %v2891_v6 }
 0x415   :  { %2459 = vmatpush3.bf16.msra.mxu0 %v2658_v37  ;;  %v2682_v37 = vld [vmem:[#allocation12 + $0x10] sm:$0xff]  }
 0x416   :  { %2460 = vmatprep.subr.bf16.mxu0 %v2891_v6 }
 0x419   :  { %2461 = vmatpush3.bf16.msra.mxu0 %v2660_v39  ;;  %v2684_v39 = vld [vmem:[#allocation12 + $0x8] sm:$0xff]  }
 0x41a   :  { %2486 = vmatprep.subr.bf16.mxu0 %v2891_v6 }
 0x41c   :  { %2463 = vmatmul.mubr.bf16.vlgmr.msra.gmra.mxu0 %v2662_v41  ;;  %v2686_v41 = vld [vmem:[#allocation12] sm:$0xff]  }
 0x41d   :  { %2502 = vmatprep.mubr.msk.bf16.mxu0 %vm2892_vm0, %v2891_v6  ;;  %2487 = vmatpush3.bf16.msra.mxu0 %v2664_v43  ;;  %v1672_v43 = vsub.s32 4, %v3171_v53 }
 0x41e   :  { %2488 = vmatprep.subr.bf16.mxu0 %v2891_v6 }
 0x421   :  { %2489 = vmatpush3.bf16.msra.mxu0 %v2665_v44  ;;  %v1673_v44 = vrot.slane %v3176_v0, %v1672_v43 }
 0x422   :  { %2490 = vmatprep.subr.bf16.mxu0 %v2891_v6 }
 0x425   :  { %2491 = vmatpush3.bf16.msra.mxu0 %v2666_v45 }
 0x426   :  { %2492 = vmatprep.subr.bf16.mxu0 %v2891_v6 }
 0x429   :  { %2493 = vmatpush3.bf16.msra.mxu0 %v2667_v46 }
 0x42a   :  { %2494 = vmatprep.subr.bf16.mxu0 %v2891_v6 }
 0x42d   :  { %2495 = vmatpush3.bf16.msra.mxu0 %v2668_v47 }
 0x42e   :  { %2496 = vmatprep.subr.bf16.mxu0 %v2891_v6 }
 0x431   :  { %2497 = vmatpush3.bf16.msra.mxu0 %v2669_v57 }
 0x432   :  { %2498 = vmatprep.subr.bf16.mxu0 %v2891_v6 }
 0x4bc   :  { %v1374_v48 = vpop.f32.mrf.mxu0 }
 0x4bd   :  { %v1382_v49 = vmul.f32 %v1381_v35, %v1374_v48 }
 0x4be   :  { %v2445_v18 = vpop.f32.mrf.mxu0 }
 0x4bf   :  { %v1390_v19 = vrot.slane %v1382_v49, %v3241_v21 }
 0x4c1   :  { %v1391_v22 = vcombine.high %v1390_v19, %v1390_v19  ;;  %v1398_v23 = vrot.slane %v1390_v19, %v3241_v21 }
 0x4c3   :  { %v1405_v24 = vrot.slane %v1391_v22, %v3241_v21  ;;  %v1409_v25 = vrot.slane %v1398_v23, %v3174_v62  ;;  %v1896_v23 = vrot.slane %v3176_v0, %v1895_v20 }
 0x4c5   :  { %v1413_v27 = vrot.slane %v1405_v24, %v3174_v62  ;;  %v1416_v28 = vmul.f32 %v1409_v25, %v3249_v30  ;;  %v2670_v62 = vld [vmem:[#allocation11 + $0x8] sm:$0xff]   ;;  %v2671_v30 = vld [vmem:[#allocation11] sm:$0xff]  }
 0x4c6   :  { %2499 = vmatpush3.bf16.msra.mxu0 %v2670_v62 }
 0x4c7   :  { %v1417_v29 = vmul.f32 %v1413_v27, %v3252_v31  ;;  %v1422_v32 = vadd.f32 %v1421_v26, %v1416_v28  ;;  %2500 = vmatprep.subr.bf16.mxu0 %v2891_v6  ;;  %v2672_v31 = vld [vmem:[#allocation12 + $0x38] sm:$0xff]  }
 0x4c9   :  { %v1423_v33 = vadd.f32 %v1421_v26, %v1417_v29  ;;  %v1424_v50 = vmax.f32 %v1422_v32, 0.0 }
 0x4ca   :  { %2501 = vmatpush3.bf16.msra.mxu0 %v2671_v30 }
 0x4cb   :  { %v1425_v51 = vmax.f32 %v1423_v33, 0.0  ;;  %2526 = vmatprep.subr.bf16.mxu0 %v2891_v6 }
 0x4cd   :  { %v1426_v52 = vpack.c.bf16 %v1425_v51, %v1424_v50 }
 0x4cf   :  { %2483 = vmatmul.mubr.bf16.vlgmr.msra.gmra.mxu1 %v1426_v52 }
 0x4d0   :  { %2522 = vmatprep.mubr.msk.bf16.mxu1 %vm2892_vm0, %v2891_v6  ;;  %2507 = vmatpush3.bf16.msra.mxu1 %v2672_v31 }
 0x4d1   :  { %2508 = vmatprep.subr.bf16.mxu1 %v2891_v6 }
 0x4d4   :  { %2509 = vmatpush3.bf16.msra.mxu1 %v2674_v58 }
 0x4d5   :  { %2510 = vmatprep.subr.bf16.mxu1 %v2891_v6 }
 0x4d8   :  { %2511 = vmatpush3.bf16.msra.mxu1 %v2676_v59 }
 0x4d9   :  { %2512 = vmatprep.subr.bf16.mxu1 %v2891_v6 }
 0x4dc   :  { %v1549_v21 = vpop.f32.mrf.mxu0  ;;  %2513 = vmatpush3.bf16.msra.mxu1 %v2678_v60 }
 0x4dd   :  { %2514 = vmatprep.subr.bf16.mxu1 %v2891_v6 }
 0x4de   :  { %v2464_v54 = vpop.f32.mrf.mxu0 }
 0x4e0   :  { %v1552_v55 = vpop.f32.mrf.mxu0  ;;  %2515 = vmatpush3.bf16.msra.mxu1 %v2680_v61 }
 0x4e1   :  { %2516 = vmatprep.subr.bf16.mxu1 %v2891_v6 }
 0x4e2   :  { %v2465_v56 = vpop.f32.mrf.mxu0 }
 0x4e4   :  { %2517 = vmatpush3.bf16.msra.mxu1 %v2682_v37 }
 0x4e5   :  { %2518 = vmatprep.subr.bf16.mxu1 %v2891_v6 }
 0x4e8   :  { %2519 = vmatpush3.bf16.msra.mxu1 %v2684_v39 }
 0x4e9   :  { %2520 = vmatprep.subr.bf16.mxu1 %v2891_v6 }
 0x4ec   :  { %2521 = vmatpush3.bf16.msra.mxu1 %v2686_v41 }
 0x58f   :  { %v1638_v1 = vpop.f32.mrf.mxu1 }
 0x590   :  { %v1639_v2 = vadd.f32 %v1638_v1, %v1549_v21 }
 0x591   :  { %v2484_v4 = vpop.f32.mrf.mxu1 }
 0x592   :  { %v1649_v7 = vadd.f32 %v1648_v3, %v1639_v2 }
 0x593   :  { %v1641_v5 = vpop.f32.mrf.mxu1 }
 0x594   :  { %v1642_v8 = vadd.f32 %v1641_v5, %v1552_v55  ;;  %v1651_v11 = vmax.f32 %v1649_v7, 0.0 }
 0x595   :  { %v2485_v9 = vpop.f32.mrf.mxu1 }
 0x596   :  { %v1650_v10 = vadd.f32 %v1648_v3, %v1642_v8 }
 0x598   :  { %v1652_v12 = vmax.f32 %v1650_v10, 0.0 }
 0x59a   :  { %v1653_v14 = vpack.c.bf16 %v1652_v12, %v1651_v11 }
 0x59c   :  { %2503 = vmatmul.mubr.bf16.vlgmr.msra.gmra.mxu0 %v1653_v14 }
 0x59d   :  { %2527 = vmatpush3.bf16.msra.mxu0 %v2673_v13  ;;  %2542 = vmatprep.mubr.msk.bf16.mxu0 %vm2892_vm0, %v2891_v6 }
 0x59e   :  { %2528 = vmatprep.subr.bf16.mxu0 %v2891_v6 }
 0x5a1   :  { %2529 = vmatpush3.bf16.msra.mxu0 %v2675_v15 }
 0x5a2   :  { %2530 = vmatprep.subr.bf16.mxu0 %v2891_v6 }
 0x5a5   :  { %2531 = vmatpush3.bf16.msra.mxu0 %v2677_v16 }
 0x5a6   :  { %2532 = vmatprep.subr.bf16.mxu0 %v2891_v6 }
 0x5a9   :  { %2533 = vmatpush3.bf16.msra.mxu0 %v2679_v17 }
 0x5aa   :  { %2534 = vmatprep.subr.bf16.mxu0 %v2891_v6 }
 0x5ad   :  { %2535 = vmatpush3.bf16.msra.mxu0 %v2681_v36 }
 0x5ae   :  { %2536 = vmatprep.subr.bf16.mxu0 %v2891_v6 }
 0x5b1   :  { %2537 = vmatpush3.bf16.msra.mxu0 %v2683_v38 }
 0x5b2   :  { %2538 = vmatprep.subr.bf16.mxu0 %v2891_v6 }
 0x5b5   :  { %2539 = vmatpush3.bf16.msra.mxu0 %v2685_v40 }
 0x5b6   :  { %2540 = vmatprep.subr.bf16.mxu0 %v2891_v6  ;;  %v1784_v6 = vsub.s32 5, %v3171_v53 }
 0x5b8   :  { %v1785_v22 = vrot.slane %v3176_v0, %v1784_v6 }
 0x5b9   :  { %2541 = vmatpush3.bf16.msra.mxu0 %v2687_v42 }
 0x65c   :  { %v1756_v45 = vpop.f32.mrf.mxu0 }
 0x65d   :  { %v1757_v47 = vadd.f32 %v1756_v45, %v1673_v44 }
 0x65e   :  { %v2504_v46 = vpop.f32.mrf.mxu0 }
 0x65f   :  { %v1763_v49 = vmax.f32 %v1757_v47, 0.0 }
 0x660   :  { %v1759_v34 = vpop.f32.mrf.mxu0 }
 0x661   :  { %v1760_v35 = vadd.f32 %v1759_v34, %v1673_v44 }
 0x662   :  { %v2505_v48 = vpop.f32.mrf.mxu0 }
 0x663   :  { %v1764_v18 = vmax.f32 %v1760_v35, 0.0 }
 0x665   :  { %v1765_v19 = vpack.c.bf16 %v1764_v18, %v1763_v49 }
 0x667   :  { %2523 = vmatmul.mubr.bf16.vlgmr.msra.gmra.mxu1 %v1765_v19  ;;  %2543 = vmatmul.mubr.bf16.vlgmr.msra.gmra.mxu0 %v1765_v19 }
 0x727   :  { %v1868_v24 = vpop.f32.mrf.mxu1  ;;  %v1979_v25 = vpop.f32.mrf.mxu0 }
 0x728   :  { %v1869_v26 = vadd.f32 %v1868_v24, %v1785_v22  ;;  %v1980_v27 = vadd.f32 %v1979_v25, %v1896_v23 }
 0x729   :  { %v2524_v28 = vpop.f32.mrf.mxu1  ;;  %v2544_v29 = vpop.f32.mrf.mxu0 }
 0x72a   :  { %1875 = vst [vmem:[#allocation15] sm:$0xff] %v1869_v26  ;;  %1986 = vst [vmem:[#allocation16] sm:$0xff] %v1980_v27 }
 0x72b   :  { %v1871_v32 = vpop.f32.mrf.mxu1  ;;  %v1982_v33 = vpop.f32.mrf.mxu0 }
 0x72c   :  { %v1872_v53 = vadd.f32 %v1871_v32, %v1785_v22  ;;  %v1983_v50 = vadd.f32 %v1982_v33, %v1896_v23 }
 0x72d   :  { %v2525_v51 = vpop.f32.mrf.mxu1  ;;  %v2545_v52 = vpop.f32.mrf.mxu0 }
 0x72e   :  { %1876 = vst [vmem:[#allocation15 + $0x8] sm:$0xff] %v1872_v53  ;;  %1987 = vst [vmem:[#allocation16 + $0x8] sm:$0xff] %v1983_v50 }
 0x72f   :  { %2841 = shalt.err (!%p2838_p11)
}
 0x730   :  { %s2896_s3 = smov 128   ;;  %s2897_s18 = smov 8  }
 0x731   :  { %1999 = dma.vmem_to_hbm [thread:$0]  %s1994_s15, 256, %s3368_s11, [#allocation5], %s2896_s3, %s2896_s3, %s2897_s18  }
 0x732   :  { %s2850_s4 = scalar_lea.vmem %s2006_s0, 256  ;;  %p2855_p13 = scmp.lt.s32.totalorder %s2006_s0, %s2006_s0 }
 0x733   :  { %p2851_p12 = scmp.ne.s32.totalorder %s2006_s0, %s2850_s4  ;;  %p2856_p0 = scmp.lt.s32.totalorder %s2850_s4, %s2850_s4 }
 0x735   :  { %p2857_p1 = por %p2856_p0, %p2855_p13 }
 0x737   :  { %p2858_p2 = pnand %p2857_p1, %p2851_p12 }
 0x739   :  { %2861 = shalt.err (!%p2858_p2)
}
 0x73a   :  { %2011 = dma.vmem_to_hbm [thread:$0]  %s2006_s0, 256, %s3369_s12, [#allocation17], %s2896_s3, %s2896_s3, %s2897_s18  }
 0x73b   :  { %2878 = dma.done.wait [#allocation5], 256  }
 0x73c   :  { %2879 = vsyncadd [#allocation5], 4294967040 }
 0x73d   :  { %2880 = dma.done.wait [#allocation17], 256  }
 0x73e   :  { %2881 = vsyncadd [#allocation17], 4294967040 }
 0x73f   :  { %2018 = vsyncpa [#allocation4], 1 }
 0x740   :  { %2019 = vsyncpa [#allocation7], 1 }
 0x741   :  { %2020 = vsyncpa [#allocation10], 1 }
 0x742   :  { %2021 = vsyncpa [#allocation13], 1 }
 0x743   :  { %2022 = vsyncpa [#allocation5], 1 }
 0x744   :  { %2023 = vsyncpa [#allocation17], 1 }

</bundles_post_ra>
